<compile_context>
chip_gen: v7x
topology: tpu7x:2x2x1
jax: 0.10.0
libtpu: 0.0.40
codegen_flags: <defaults>
</compile_context>

<pallas_src>
import jax
import jax.numpy as jnp
from jax.experimental import pallas as pl
from jax.experimental.pallas import tpu as pltpu


def _se_gate_conv_kernel(xse_ref, w1_ref, b1_ref, x_ref, w2_ref, o_ref):
    """One grid step: SE projection + sigmoid gate + 1x1 conv (channel matmul).

    xse_ref: [1, CIN]  f32   (squeezed SE input vector)
    w1_ref : [C, CIN]  f32   (conv2d62 weight)
    b1_ref : [C, 1]    f32   (conv2d62 bias)
    x_ref  : [C, HW]   f32   (feature map, channel-major)
    w2_ref : [CM, C]   bf16  (this core's slab of conv2d63 weight)
    o_ref  : [CM, HW]  f32
    """
    # SE projection on the VPU/XLU (K=84, N=1 would waste a full MXU tile):
    # elementwise multiply + cross-lane reduce, then bias + sigmoid (EUP).
    s = jax.nn.sigmoid(
        jnp.sum(w1_ref[...] * xse_ref[...], axis=-1, keepdims=True) + b1_ref[...]
    )  # [C, 1] f32

    # Gate the feature map (broadcast along the spatial/lane axis), then cast
    # to bf16 to feed the MXU (f32 accumulation kept below).
    gated = (s * x_ref[...]).astype(w2_ref.dtype)  # [C, HW] bf16

    # Second 1x1 conv (no bias) == channel matmul on the MXU.
    o_ref[...] = jnp.dot(w2_ref[...], gated, preferred_element_type=jnp.float32)


def _num_tensorcores():
    """2-way output split only on 2-TC chips (v7x); sequential elsewhere."""
    try:
        kind = jax.devices()[0].device_kind.lower()
        if "v7" in kind:
            return 2
    except Exception:
        pass
    return 1


def make_se_gate_conv(w1, b1, w2, n_cores=None):
    """One-time parameter prep (hoisted out of the per-call path).

    Returns a jitted callable (x194, x191) -> [1, C, H, W].
    """
    if n_cores is None:
        n_cores = _num_tensorcores()

    c, cin = w1.shape
    assert w2.shape == (c, c)
    assert c % n_cores == 0
    cm = c // n_cores

    # Pre-built device constants: no per-call cast/pad/reshape traffic.
    w1_p = jnp.asarray(w1, jnp.float32)                       # [C, CIN] f32
    b1_p = jnp.asarray(b1, jnp.float32).reshape(c, 1)         # [C, 1]   f32
    w2_p = jnp.asarray(w2, jnp.bfloat16).reshape(n_cores, cm, c)  # per-core slabs

    def call(x194, x191):
        n, cin_, _, _ = x194.shape
        n2, c_, h, w = x191.shape
        assert n == 1 and n2 == 1 and cin_ == cin and c_ == c
        hw = h * w

        # Pure reshapes of contiguous data (no HBM passes).
        xse = x194.reshape(1, cin)
        ximg = x191.reshape(c, hw)

        cost = pl.CostEstimate(
            flops=2 * c * c * hw + 2 * c * cin,
            transcendentals=c,
            bytes_accessed=(ximg.size * 4 + w2_p.size * 2 + w1_p.size * 4
                            + b1_p.size * 4 + xse.size * 4 + c * hw * 4),
        )

        out = pl.pallas_call(
            _se_gate_conv_kernel,
            out_shape=jax.ShapeDtypeStruct((n_cores, cm, hw), jnp.float32),
            grid=(n_cores,),
            in_specs=[
                pl.BlockSpec((1, cin), lambda i: (0, 0)),          # xse (replicated)
                pl.BlockSpec((c, cin), lambda i: (0, 0)),          # w1  (replicated)
                pl.BlockSpec((c, 1), lambda i: (0, 0)),            # b1  (replicated)
                pl.BlockSpec((c, hw), lambda i: (0, 0)),           # feature map
                pl.BlockSpec((None, cm, c), lambda i: (i, 0, 0)),  # w2 slab per core
            ],
            out_specs=pl.BlockSpec((None, cm, hw), lambda i: (i, 0, 0)),
            compiler_params=pltpu.CompilerParams(
                dimension_semantics=("parallel",)
            ),
            cost_estimate=cost,
        )(xse, w1_p, b1_p, ximg, w2_p)

        # Contiguous reshape (n_cores, cm, hw) -> (1, C, H, W): free bitcast.
        return out.reshape(1, c, h, w)

    return jax.jit(call)


def reference(x194, x191, w1, b1, w2):
    """Plain-JAX f32 reference of the PyTorch forward (NCHW, 1x1 convs)."""
    cin = x194.shape[1]
    c = x191.shape[1]
    h, w = x191.shape[2], x191.shape[3]
    s = jax.nn.sigmoid(w1 @ x194.reshape(cin, 1) + b1.reshape(c, 1))  # [C, 1]
    gated = s.reshape(1, c, 1, 1) * x191                              # [1, C, H, W]
    out = (w2 @ gated.reshape(c, h * w)).reshape(1, c, h, w)
    return out


if __name__ == "__main__":
    key = jax.random.PRNGKey(0)
    k1, k2, k3, k4, k5 = jax.random.split(key, 5)

    CIN, C, H, W = 84, 336, 14, 14

    # Inputs (same shapes as the module's forward).
    x194 = jax.random.normal(k1, (1, CIN, 1, 1), dtype=jnp.float32)
    x191 = jax.random.normal(k2, (1, C, H, W), dtype=jnp.float32)

    # Deterministic parameter init (Conv2d 1x1 weights squeezed to matrices).
    w1 = jax.random.normal(k3, (C, CIN), dtype=jnp.float32) * 0.05  # conv2d62.weight
    b1 = jax.random.normal(k4, (C,), dtype=jnp.float32) * 0.05      # conv2d62.bias
    w2 = jax.random.normal(k5, (C, C), dtype=jnp.float32) * 0.05    # conv2d63.weight

    se_fn = make_se_gate_conv(w1, b1, w2)   # one-time weight prep here
    out = jax.block_until_ready(se_fn(x194, x191))

    ref = reference(x194, x191, w1, b1, w2)
    assert out.shape == (1, C, H, W)
    # bf16 weights/activations feed the big matmul -> relaxed tolerance vs f32.
    assert jnp.allclose(out, ref, atol=2e-2, rtol=2e-2), "mismatch vs reference"

    print("KERNEL_OK")
</pallas_src>

<mosaic_0001>
module attributes {stable_mosaic.version = 11 : i64} {
  func.func @_se_gate_conv_kernel(%arg0: i32, %arg1: memref<1x84xf32, #tpu.memory_space<vmem>>, %arg2: memref<336x84xf32, #tpu.memory_space<vmem>>, %arg3: memref<336x1xf32, #tpu.memory_space<vmem>>, %arg4: memref<336x196xf32, #tpu.memory_space<vmem>>, %arg5: memref<1x336x336xbf16, #tpu.memory_space<vmem>>, %arg6: memref<1x336x196xf32, #tpu.memory_space<vmem>>) attributes {dimension_semantics = [#tpu.dimension_semantics<parallel>], iteration_bounds = array<i64: 1>, scalar_prefetch = 0 : i64, scratch_operands = 0 : i64, tpu.core_type = #tpu.core_type<tc>, window_params = [{pipeline_mode = #tpu.pipeline_mode<synchronous>, transform_indices = @transform_0, window_bounds = array<i64: 1, 84>}, {pipeline_mode = #tpu.pipeline_mode<synchronous>, transform_indices = @transform_1, window_bounds = array<i64: 336, 84>}, {pipeline_mode = #tpu.pipeline_mode<synchronous>, transform_indices = @transform_2, window_bounds = array<i64: 336, 1>}, {pipeline_mode = #tpu.pipeline_mode<synchronous>, transform_indices = @transform_3, window_bounds = array<i64: 336, 196>}, {transform_indices = @transform_4, window_bounds = array<i64: 1, 336, 336>}, {transform_indices = @transform_5, window_bounds = array<i64: 1, 336, 196>}]} {
    %c0 = arith.constant 0 : index
    %c0_0 = arith.constant 0 : index
    %0 = vector.load %arg2[%c0, %c0_0] : memref<336x84xf32, #tpu.memory_space<vmem>>, vector<336x84xf32>
    %c0_1 = arith.constant 0 : index
    %c0_2 = arith.constant 0 : index
    %1 = vector.load %arg1[%c0_1, %c0_2] : memref<1x84xf32, #tpu.memory_space<vmem>>, vector<1x84xf32>
    %2 = vector.broadcast %1 : vector<1x84xf32> to vector<336x84xf32>
    %3 = arith.mulf %0, %2 : vector<336x84xf32>
    %cst = arith.constant dense<0.000000e+00> : vector<336xf32>
    %4 = vector.multi_reduction <add>, %3, %cst [1] : vector<336x84xf32> to vector<336xf32>
    %5 = vector.shape_cast %4 : vector<336xf32> to vector<336x1xf32>
    %c0_3 = arith.constant 0 : index
    %c0_4 = arith.constant 0 : index
    %6 = vector.load %arg3[%c0_3, %c0_4] : memref<336x1xf32, #tpu.memory_space<vmem>>, vector<336x1xf32>
    %7 = arith.addf %5, %6 : vector<336x1xf32>
    %8 = arith.negf %7 : vector<336x1xf32>
    %9 = math.exp %8 : vector<336x1xf32>
    %cst_5 = arith.constant 1.000000e+00 : f32
    %10 = vector.broadcast %cst_5 : f32 to vector<336x1xf32>
    %11 = arith.addf %10, %9 : vector<336x1xf32>
    %12 = arith.divf %10, %11 : vector<336x1xf32>
    %c0_6 = arith.constant 0 : index
    %c0_7 = arith.constant 0 : index
    %13 = vector.load %arg4[%c0_6, %c0_7] : memref<336x196xf32, #tpu.memory_space<vmem>>, vector<336x196xf32>
    %14 = vector.broadcast %12 : vector<336x1xf32> to vector<336x196xf32>
    %15 = arith.mulf %14, %13 : vector<336x196xf32>
    %16 = arith.truncf %15 : vector<336x196xf32> to vector<336x196xbf16>
    %c0_8 = arith.constant 0 : index
    %c0_9 = arith.constant 0 : index
    %c0_10 = arith.constant 0 : index
    %17 = vector.load %arg5[%c0_8, %c0_9, %c0_10] : memref<1x336x336xbf16, #tpu.memory_space<vmem>>, vector<1x336x336xbf16>
    %18 = vector.shape_cast %17 : vector<1x336x336xbf16> to vector<336x336xbf16>
    %cst_11 = arith.constant dense<0.000000e+00> : vector<336x196xf32>
    %19 = tpu.matmul %18, %16, %cst_11 {dimension_numbers = #tpu.dot_dimension_numbers<[1], [0], [0], [1], [0, 0, 1, 1], [], []>} : vector<336x336xbf16>, vector<336x196xbf16>, vector<336x196xf32> -> vector<336x196xf32>
    %c0_12 = arith.constant 0 : index
    %c0_13 = arith.constant 0 : index
    %c0_14 = arith.constant 0 : index
    %20 = vector.load %arg6[%c0_12, %c0_13, %c0_14] : memref<1x336x196xf32, #tpu.memory_space<vmem>>, vector<1x336x196xf32>
    %21 = vector.shape_cast %20 : vector<1x336x196xf32> to vector<336x196xf32>
    %22 = vector.shape_cast %19 : vector<336x196xf32> to vector<1x336x196xf32>
    tpu.vector_store %arg6[%c0_12, %c0_13, %c0_14], %22 {strides = array<i32>} : memref<1x336x196xf32, #tpu.memory_space<vmem>>, vector<1x336x196xf32>,
    return
  }
  func.func @transform_0(%arg0: i32) -> (i32, i32) {
    %c0_i32 = arith.constant 0 : i32
    %c0_i32_0 = arith.constant 0 : i32
    %c0_i32_1 = arith.constant 0 : i32
    return %c0_i32, %c0_i32_0 : i32, i32
  }
  func.func @transform_1(%arg0: i32) -> (i32, i32) {
    %c0_i32 = arith.constant 0 : i32
    %c0_i32_0 = arith.constant 0 : i32
    %c0_i32_1 = arith.constant 0 : i32
    return %c0_i32, %c0_i32_0 : i32, i32
  }
  func.func @transform_2(%arg0: i32) -> (i32, i32) {
    %c0_i32 = arith.constant 0 : i32
    %c0_i32_0 = arith.constant 0 : i32
    %c0_i32_1 = arith.constant 0 : i32
    return %c0_i32, %c0_i32_0 : i32, i32
  }
  func.func @transform_3(%arg0: i32) -> (i32, i32) {
    %c0_i32 = arith.constant 0 : i32
    %c0_i32_0 = arith.constant 0 : i32
    %c0_i32_1 = arith.constant 0 : i32
    return %c0_i32, %c0_i32_0 : i32, i32
  }
  func.func @transform_4(%arg0: i32) -> (i32, i32, i32) {
    %c0_i32 = arith.constant 0 : i32
    %c0_i32_0 = arith.constant 0 : i32
    %c0_i32_1 = arith.constant 0 : i32
    return %arg0, %c0_i32, %c0_i32_0 : i32, i32, i32
  }
  func.func @transform_5(%arg0: i32) -> (i32, i32, i32) {
    %c0_i32 = arith.constant 0 : i32
    %c0_i32_0 = arith.constant 0 : i32
    %c0_i32_1 = arith.constant 0 : i32
    return %arg0, %c0_i32, %c0_i32_0 : i32, i32, i32
  }
}

</mosaic_0001>

<bundles_post_ra>
// kernel: call.1
= control target key start
LH: loop header
LB: loop body
LE: loop exit
PB: predicated region body
PF: predicated region fallthrough
CT: control target
= control target key end

     0   :  { %vm112_vm0 = vcmask 687104   ;;  %vm1394_vm1 = vcmask 654336   ;;  %vm1945_vm2 = vcmask 556032   ;;  %s3680_s0 = inlined_call_operand.vmem [shape: f32[1,84], index: 0, kind: input, shape index: {}]   ;;  %s3681_s1 = inlined_call_operand.vmem [shape: f32[336,84], index: 1, kind: input, shape index: {}]   ;;  %s3682_s2 = inlined_call_operand.vmem [shape: f32[336,1], index: 2, kind: input, shape index: {}]   ;;  %s3683_s4 = inlined_call_operand.vmem [shape: bf16[1,336,336], index: 4, kind: input, shape index: {}]   ;;  %s3684_s3 = inlined_call_operand.vmem [shape: f32[336,196], index: 3, kind: input, shape index: {}]   ;;  %s3685_s5 = inlined_call_operand.vmem [shape: f32[1,336,196], index: 5, kind: output, shape index: {}]  }
   0x1   :  { %v23_v0 = vld [vmem:[%s3681_s1 + $0x10] sm:$0xff]  ;;  %v2536_v1 = vld [vmem:[%s3680_s0] ss:$0 sm:$0xff]  ;;  %v24_v5 = vld [vmem:[%s3681_s1 + $0x18] sm:$0xff] }
   0x2   :  { %v21_v2 = vld [vmem:[%s3681_s1] sm:$0xff]  ;;  %v72_v3 = vmul.f32 %v2536_v1, %v23_v0  ;;  %v22_v6 = vld [vmem:[%s3681_s1 + $0x8] sm:$0xff]  ;;  %v73_v7 = vmul.f32 %v2536_v1, %v24_v5  ;;  %v28_v17 = vld [vmem:[%s3681_s1 + $0x38] sm:$0xff] }
   0x3   :  { %v70_v4 = vmul.f32 %v2536_v1, %v21_v2  ;;  %v71_v8 = vmul.f32 %v2536_v1, %v22_v6  ;;  %v26_v9 = vld [vmem:[%s3681_s1 + $0x28] sm:$0xff]  ;;  %v25_v10 = vld [vmem:[%s3681_s1 + $0x20] sm:$0xff]  ;;  %v27_v18 = vld [vmem:[%s3681_s1 + $0x30] sm:$0xff]  ;;  %v77_v20 = vmul.f32 %v2536_v1, %v28_v17 }
   0x4   :  { %v119_v11 = vsel %vm112_vm0, %v72_v3, 0.0  ;;  %v122_v13 = vsel %vm112_vm0, %v73_v7, 0.0  ;;  %v75_v15 = vmul.f32 %v2536_v1, %v26_v9  ;;  %v74_v16 = vmul.f32 %v2536_v1, %v25_v10  ;;  %v30_v23 = vld [vmem:[%s3681_s1 + $0x48] sm:$0xff]  ;;  %v29_v24 = vld [vmem:[%s3681_s1 + $0x40] sm:$0xff]  ;;  %v32_v25 = vld [vmem:[%s3681_s1 + $0x58] sm:$0xff] }
   0x5   :  { %v113_v12 = vsel %vm112_vm0, %v70_v4, 0.0  ;;  %120 = vadd.xlane.f32.xlu1 %v119_v11  ;;  %v116_v14 = vsel %vm112_vm0, %v71_v8, 0.0  ;;  %v76_v22 = vmul.f32 %v2536_v1, %v27_v18  ;;  %v58_v26 = vld [vmem:[%s3681_s1 + $0x128] sm:$0xff]  ;;  %v134_v28 = vsel %vm112_vm0, %v77_v20, 0.0  ;;  %v31_v32 = vld [vmem:[%s3681_s1 + $0x50] sm:$0xff]  ;;  %v60_v35 = vld [vmem:[%s3681_s1 + $0x138] sm:$0xff] }
   0x6   :  { %114 = vadd.xlane.f32.xlu0 %v113_v12  ;;  %v128_v19 = vsel %vm112_vm0, %v75_v15, 0.0  ;;  %v125_v21 = vsel %vm112_vm0, %v74_v16, 0.0  ;;  %v50_v27 = vld [vmem:[%s3681_s1 + $0xe8] sm:$0xff]  ;;  %v79_v29 = vmul.f32 %v2536_v1, %v30_v23  ;;  %v78_v31 = vmul.f32 %v2536_v1, %v29_v24  ;;  %v52_v38 = vld [vmem:[%s3681_s1 + $0xf8] sm:$0xff]  ;;  %v33_v41 = vld [vmem:[%s3681_s1 + $0x60] sm:$0xff] }
   0x7   :  { %v131_v30 = vsel %vm112_vm0, %v76_v22, 0.0  ;;  %v81_v33 = vmul.f32 %v2536_v1, %v32_v25  ;;  %v107_v34 = vmul.f32 %v2536_v1, %v58_v26  ;;  %v34_v36 = vld [vmem:[%s3681_s1 + $0x68] sm:$0xff]  ;;  %v99_v37 = vmul.f32 %v2536_v1, %v50_v27  ;;  %v57_v43 = vld [vmem:[%s3681_s1 + $0x120] sm:$0xff]  ;;  %v59_v49 = vld [vmem:[%s3681_s1 + $0x130] sm:$0xff] }
   0x8   :  { %v62_v39 = vld [vmem:[%s3681_s1 + $0x148] sm:$0xff]  ;;  %v80_v40 = vmul.f32 %v2536_v1, %v31_v32  ;;  %v49_v44 = vld [vmem:[%s3681_s1 + $0xe0] sm:$0xff]  ;;  %v140_v45 = vsel %vm112_vm0, %v79_v29, 0.0  ;;  %v137_v46 = vsel %vm112_vm0, %v78_v31, 0.0  ;;  %v109_v48 = vmul.f32 %v2536_v1, %v60_v35  ;;  %v51_v54 = vld [vmem:[%s3681_s1 + $0xf0] sm:$0xff] }
   0x9   :  { %123 = vadd.xlane.f32.xlu1 %v122_v13  ;;  %v2615_v42 = vsel %vm112_vm0, %v107_v34, 0.0  ;;  %v2626_v47 = vsel %vm112_vm0, %v99_v37, 0.0  ;;  %v146_v50 = vsel %vm112_vm0, %v81_v33, 0.0  ;;  %v83_v51 = vmul.f32 %v2536_v1, %v34_v36  ;;  %v61_v55 = vld [vmem:[%s3681_s1 + $0x140] sm:$0xff]  ;;  %v36_v5 = vld [vmem:[%s3681_s1 + $0x78] sm:$0xff]  ;;  %v35_v6 = vld [vmem:[%s3681_s1 + $0x70] sm:$0xff] }
   0xa   :  { %117 = vadd.xlane.f32.xlu0 %v116_v14  ;;  %v101_v52 = vmul.f32 %v2536_v1, %v52_v38  ;;  %v111_v53 = vmul.f32 %v2536_v1, %v62_v39  ;;  %v82_v56 = vmul.f32 %v2536_v1, %v33_v41  ;;  %v2644_v57 = vsel %vm112_vm0, %v109_v48, 0.0  ;;  %v38_v14 = vld [vmem:[%s3681_s1 + $0x88] sm:$0xff]  ;;  %v37_v15 = vld [vmem:[%s3681_s1 + $0x80] sm:$0xff]  ;;  %v40_v20 = vld [vmem:[%s3681_s1 + $0x98] sm:$0xff] }
   0xb   :  { %v106_v58 = vmul.f32 %v2536_v1, %v57_v43  ;;  %v98_v59 = vmul.f32 %v2536_v1, %v49_v44  ;;  %v143_v60 = vsel %vm112_vm0, %v80_v40, 0.0  ;;  %v108_v63 = vmul.f32 %v2536_v1, %v59_v49  ;;  %v42_v26 = vld [vmem:[%s3681_s1 + $0xa8] sm:$0xff]  ;;  %v41_v27 = vld [vmem:[%s3681_s1 + $0xa0] sm:$0xff]  ;;  %v44_v32 = vld [vmem:[%s3681_s1 + $0xb8] sm:$0xff] }
   0xc   :  { %v2650_v61 = vsel %vm112_vm0, %v101_v52, 0.0  ;;  %v2653_v62 = vsel %vm112_vm0, %v111_v53, 0.0  ;;  %v100_v3 = vmul.f32 %v2536_v1, %v51_v54  ;;  %v110_v4 = vmul.f32 %v2536_v1, %v61_v55  ;;  %v43_v33 = vld [vmem:[%s3681_s1 + $0xb0] sm:$0xff]  ;;  %v54_v36 = vld [vmem:[%s3681_s1 + $0x108] sm:$0xff]  ;;  %v53_v39 = vld [vmem:[%s3681_s1 + $0x100] sm:$0xff] }
   0xd   :  { %129 = vadd.xlane.f32.xlu1 %v128_v19  ;;  %v2657_v0 = vsel %vm112_vm0, %v106_v58, 0.0  ;;  %v2660_v2 = vsel %vm112_vm0, %v98_v59, 0.0  ;;  %v2671_v7 = vsel %vm112_vm0, %v108_v63, 0.0  ;;  %v152_v10 = vsel %vm112_vm0, %v83_v51, 0.0  ;;  %v56_v53 = vld [vmem:[%s3681_s1 + $0x118] sm:$0xff]  ;;  %v55_v54 = vld [vmem:[%s3681_s1 + $0x110] sm:$0xff] }
   0xe   :  { %126 = vadd.xlane.f32.xlu0 %v125_v21  ;;  %v2674_v8 = vsel %vm112_vm0, %v100_v3, 0.0  ;;  %v2677_v9 = vsel %vm112_vm0, %v110_v4, 0.0  ;;  %v85_v11 = vmul.f32 %v2536_v1, %v36_v5  ;;  %v149_v12 = vsel %vm112_vm0, %v82_v56, 0.0  ;;  %v39_v21 = vld [vmem:[%s3681_s1 + $0x90] sm:$0xff] }
   0xf   :  { %v84_v13 = vmul.f32 %v2536_v1, %v35_v6  ;;  %v87_v17 = vmul.f32 %v2536_v1, %v38_v14  ;;  %v86_v19 = vmul.f32 %v2536_v1, %v37_v15  ;;  %v89_v23 = vmul.f32 %v2536_v1, %v40_v20  ;;  %v47_v63 = vld [vmem:[%s3681_s1 + $0xd0] sm:$0xff]  ;;  %v244_v15 = vld [vmem:[%s3682_s2 + $0x28] sm:$0xff] }
  0x10   :  { %v158_v16 = vsel %vm112_vm0, %v85_v11, 0.0  ;;  %v88_v25 = vmul.f32 %v2536_v1, %v39_v21  ;;  %v91_v29 = vmul.f32 %v2536_v1, %v42_v26  ;;  %v90_v31 = vmul.f32 %v2536_v1, %v41_v27 }
  0x11   :  { %135 = vadd.xlane.f32.xlu1 %v134_v28  ;;  %v155_v18 = vsel %vm112_vm0, %v84_v13, 0.0  ;;  %v164_v22 = vsel %vm112_vm0, %v87_v17, 0.0  ;;  %v161_v24 = vsel %vm112_vm0, %v86_v19, 0.0  ;;  %v170_v28 = vsel %vm112_vm0, %v89_v23, 0.0 }
  0x12   :  { %132 = vadd.xlane.f32.xlu0 %v131_v30  ;;  %v167_v30 = vsel %vm112_vm0, %v88_v25, 0.0  ;;  %v176_v34 = vsel %vm112_vm0, %v91_v29, 0.0  ;;  %v93_v35 = vmul.f32 %v2536_v1, %v44_v32  ;;  %v173_v37 = vsel %vm112_vm0, %v90_v31, 0.0 }
  0x13   :  { %v92_v38 = vmul.f32 %v2536_v1, %v43_v33  ;;  %v103_v40 = vmul.f32 %v2536_v1, %v54_v36  ;;  %v102_v44 = vmul.f32 %v2536_v1, %v53_v39  ;;  %v2499_v48 = vmov 0   ;;  %v247_v33 = vld [vmem:[%s3682_s2 + $0x40] sm:$0xff]  ;;  %v250_v39 = vld [vmem:[%s3682_s2 + $0x58] sm:$0xff] }
  0x14   :  { %v182_v41 = vsel %vm112_vm0, %v93_v35, 0.0  ;;  %2245 = vset.pattern.permute.xlu0 %v2499_v48  ;;  %2246 = vset.pattern.permute.xlu1 %v2499_v48  ;;  %v105_v56 = vmul.f32 %v2536_v1, %v56_v53  ;;  %v104_v59 = vmul.f32 %v2536_v1, %v55_v54  ;;  %v96_v6 = vmul.f32 %v2536_v1, %v47_v63 }
  0x15   :  { %141 = vadd.xlane.f32.xlu1 %v140_v45  ;;  %v179_v43 = vsel %vm112_vm0, %v92_v38, 0.0  ;;  %v46_v45 = vld [vmem:[%s3681_s1 + $0xc8] sm:$0xff]  ;;  %1733 = vmatprep.mubr.bf16.mxu0 %v2499_v48  ;;  %v212_v49 = vsel %vm112_vm0, %v103_v40, 0.0  ;;  %v209_v51 = vsel %vm112_vm0, %v102_v44, 0.0  ;;  %v249_v44 = vld [vmem:[%s3682_s2 + $0x50] sm:$0xff] }
  0x16   :  { %138 = vadd.xlane.f32.xlu0 %v137_v46  ;;  %v45_v46 = vld [vmem:[%s3681_s1 + $0xc0] sm:$0xff]  ;;  %v218_v3 = vsel %vm112_vm0, %v105_v56, 0.0  ;;  %v215_v5 = vsel %vm112_vm0, %v104_v59, 0.0  ;;  %v191_v11 = vsel %vm112_vm0, %v96_v6, 0.0 }
  0x17   :  { %v94_v52 = vmul.f32 %v2536_v1, %v45_v46  ;;  %v251_v6 = vld [vmem:[%s3682_s2 + $0x60] sm:$0xff] }
  0x19   :  { %147 = vadd.xlane.f32.xlu1 %v146_v50  ;;  %v95_v50 = vmul.f32 %v2536_v1, %v46_v45  ;;  %v185_v58 = vsel %vm112_vm0, %v94_v52, 0.0 }
  0x1a   :  { %144 = vadd.xlane.f32.xlu0 %v143_v60  ;;  %v48_v60 = vld [vmem:[%s3681_s1 + $0xd8] sm:$0xff] }
  0x1b   :  { %v188_v55 = vsel %vm112_vm0, %v95_v50, 0.0  ;;  %v97_v4 = vmul.f32 %v2536_v1, %v48_v60  ;;  %v241_v1 = vld [vmem:[%s3682_s2 + $0x10] sm:$0xff] }
  0x1d   :  { %153 = vadd.xlane.f32.xlu1 %v152_v10  ;;  %v194_v10 = vsel %vm112_vm0, %v97_v4, 0.0 }
  0x1e   :  { %150 = vadd.xlane.f32.xlu0 %v149_v12 }
  0x21   :  { %159 = vadd.xlane.f32.xlu1 %v158_v16  ;;  %v243_v16 = vld [vmem:[%s3682_s2 + $0x20] sm:$0xff] }
  0x22   :  { %156 = vadd.xlane.f32.xlu0 %v155_v18 }
  0x25   :  { %165 = vadd.xlane.f32.xlu1 %v164_v22 }
  0x26   :  { %162 = vadd.xlane.f32.xlu0 %v161_v24  ;;  %v245_v24 = vld [vmem:[%s3682_s2 + $0x30] sm:$0xff] }
  0x29   :  { %171 = vadd.xlane.f32.xlu1 %v170_v28  ;;  %v248_v28 = vld [vmem:[%s3682_s2 + $0x48] sm:$0xff] }
  0x2a   :  { %168 = vadd.xlane.f32.xlu0 %v167_v30  ;;  %v246_v30 = vld [vmem:[%s3682_s2 + $0x38] sm:$0xff] }
  0x2d   :  { %177 = vadd.xlane.f32.xlu1 %v176_v34 }
  0x2e   :  { %174 = vadd.xlane.f32.xlu0 %v173_v37 }
  0x31   :  { %183 = vadd.xlane.f32.xlu1 %v182_v41 }
  0x32   :  { %180 = vadd.xlane.f32.xlu0 %v179_v43 }
  0x35   :  { %213 = vadd.xlane.f32.xlu1 %v212_v49 }
  0x36   :  { %210 = vadd.xlane.f32.xlu0 %v209_v51 }
  0x39   :  { %189 = vadd.xlane.f32.xlu1 %v188_v55  ;;  %v252_v55 = vld [vmem:[%s3682_s2 + $0x68] sm:$0xff] }
  0x3a   :  { %186 = vadd.xlane.f32.xlu0 %v185_v58 }
  0x3d   :  { %219 = vadd.xlane.f32.xlu1 %v218_v3 }
  0x3e   :  { %216 = vadd.xlane.f32.xlu0 %v215_v5 }
  0x41   :  { %195 = vadd.xlane.f32.xlu1 %v194_v10 }
  0x42   :  { %192 = vadd.xlane.f32.xlu0 %v191_v11  ;;  %v254_v11 = vld [vmem:[%s3682_s2 + $0x78] sm:$0xff] }
  0x45   :  { %225 = vadd.xlane.f32.xlu1 %v2615_v42  ;;  %v239_v42 = vld [vmem:[%s3682_s2] sm:$0xff] }
  0x46   :  { %222 = vadd.xlane.f32.xlu0 %v2657_v0 }
  0x49   :  { %201 = vadd.xlane.f32.xlu1 %v2626_v47 }
  0x4a   :  { %198 = vadd.xlane.f32.xlu0 %v2660_v2 }
  0x4d   :  { %231 = vadd.xlane.f32.xlu1 %v2644_v57 }
  0x4e   :  { %228 = vadd.xlane.f32.xlu0 %v2671_v7 }
  0x51   :  { %207 = vadd.xlane.f32.xlu1 %v2650_v61  ;;  %v242_v61 = vld [vmem:[%s3682_s2 + $0x18] sm:$0xff] }
  0x52   :  { %204 = vadd.xlane.f32.xlu0 %v2674_v8 }
  0x55   :  { %237 = vadd.xlane.f32.xlu1 %v2653_v62  ;;  %v240_v62 = vld [vmem:[%s3682_s2 + $0x8] sm:$0xff] }
  0x56   :  { %234 = vadd.xlane.f32.xlu0 %v2677_v9 }
  0x92   :  { %v121_v47 = vpop.xlane.xlu1 %120 }
  0x93   :  { %v115_v57 = vpop.xlane.xlu0 %114  ;;  %v283_v0 = vadd.f32 %v241_v1, %v121_v47 }
  0x94   :  { %v281_v2 = vadd.f32 %v239_v42, %v115_v57 }
  0x95   :  { %v2036_v7 = vmul.f32 -1.442695, %v283_v0 }
  0x96   :  { %v2034_v8 = vmul.f32 -1.442695, %v281_v2  ;;  %v124_v9 = vpop.xlane.xlu1 %123 }
  0x97   :  { %v118_v12 = vpop.xlane.xlu0 %117  ;;  %v284_v13 = vadd.f32 %v242_v61, %v124_v9  ;;  %v256_v9 = vld [vmem:[%s3682_s2 + $0x88] sm:$0xff] }
  0x98   :  { %v282_v14 = vadd.f32 %v240_v62, %v118_v12  ;;  %2331 = vpow2.f32 %v2034_v8  ;;  %v253_v8 = vld [vmem:[%s3682_s2 + $0x70] sm:$0xff] }
  0x99   :  { %2333 = vpow2.f32 %v2036_v7  ;;  %v2037_v17 = vmul.f32 -1.442695, %v284_v13 }
  0x9a   :  { %v2035_v18 = vmul.f32 -1.442695, %v282_v14  ;;  %v130_v19 = vpop.xlane.xlu1 %129 }
  0x9b   :  { %v127_v20 = vpop.xlane.xlu0 %126  ;;  %v286_v21 = vadd.f32 %v244_v15, %v130_v19 }
  0x9c   :  { %v285_v22 = vadd.f32 %v243_v16, %v127_v20  ;;  %2335 = vpow2.f32 %v2035_v18 }
  0x9d   :  { %2337 = vpow2.f32 %v2037_v17  ;;  %v2039_v23 = vmul.f32 -1.442695, %v286_v21 }
  0x9e   :  { %v136_v25 = vpop.xlane.xlu1 %135  ;;  %v2038_v26 = vmul.f32 -1.442695, %v285_v22 }
  0x9f   :  { %v133_v27 = vpop.xlane.xlu0 %132  ;;  %2339 = vpow2.f32 %v2039_v23  ;;  %v288_v38 = vadd.f32 %v246_v30, %v136_v25  ;;  %v258_v23 = vld [vmem:[%s3682_s2 + $0x98] sm:$0xff] }
  0xa0   :  { %v287_v29 = vadd.f32 %v245_v24, %v133_v27  ;;  %2341 = vpow2.f32 %v2038_v26  ;;  %v255_v27 = vld [vmem:[%s3682_s2 + $0x80] sm:$0xff] }
  0xa1   :  { %v2041_v54 = vmul.f32 -1.442695, %v288_v38 }
  0xa2   :  { %v2332_v31 = vpop.eup %2331  ;;  %v142_v32 = vpop.xlane.xlu1 %141  ;;  %v2040_v40 = vmul.f32 -1.442695, %v287_v29 }
  0xa3   :  { %v139_v34 = vpop.xlane.xlu0 %138  ;;  %v2334_v35 = vpop.eup %2333  ;;  %v449_v36 = vadd.f32 1.0, %v2332_v31  ;;  %v290_v37 = vadd.f32 %v248_v28, %v142_v32 }
  0xa4   :  { %v289_v43 = vadd.f32 %v247_v33, %v139_v34  ;;  %v451_v46 = vadd.f32 1.0, %v2334_v35 }
  0xa5   :  { %2343 = vrcp.f32 %v449_v36  ;;  %v2043_v41 = vmul.f32 -1.442695, %v290_v37  ;;  %v260_v36 = vld [vmem:[%s3682_s2 + $0xa8] sm:$0xff] }
  0xa6   :  { %v2336_v45 = vpop.eup %2335  ;;  %v148_v49 = vpop.xlane.xlu1 %147  ;;  %v2042_v59 = vmul.f32 -1.442695, %v289_v43 }
  0xa7   :  { %v145_v50 = vpop.xlane.xlu0 %144  ;;  %v2338_v51 = vpop.eup %2337  ;;  %v450_v52 = vadd.f32 1.0, %v2336_v45  ;;  %2345 = vpow2.f32 %v2043_v41  ;;  %v292_v53 = vadd.f32 %v250_v39, %v148_v49 }
  0xa8   :  { %2347 = vpow2.f32 %v2040_v40  ;;  %v291_v56 = vadd.f32 %v249_v44, %v145_v50  ;;  %v452_v60 = vadd.f32 1.0, %v2338_v51  ;;  %v259_v51 = vld [vmem:[%s3682_s2 + $0xa0] sm:$0xff] }
  0xa9   :  { %2349 = vrcp.f32 %v450_v52  ;;  %v2045_v58 = vmul.f32 -1.442695, %v292_v53  ;;  %v2340_v4 = vpop.eup %2339  ;;  %v262_v53 = vld [vmem:[%s3682_s2 + $0xb8] sm:$0xff] }
  0xaa   :  { %2351 = vrcp.f32 %v451_v46  ;;  %v154_v63 = vpop.xlane.xlu1 %153  ;;  %v2342_v10 = vpop.eup %2341  ;;  %v2044_v1 = vmul.f32 -1.442695, %v291_v56  ;;  %v454_v47 = vadd.f32 1.0, %v2340_v4  ;;  %v257_v46 = vld [vmem:[%s3682_s2 + $0x90] sm:$0xff] }
  0xab   :  { %v151_v3 = vpop.xlane.xlu0 %150  ;;  %2353 = vpow2.f32 %v2045_v58  ;;  %v294_v5 = vadd.f32 %v252_v55, %v154_v63  ;;  %v453_v62 = vadd.f32 1.0, %v2342_v10  ;;  %v261_v10 = vld [vmem:[%s3682_s2 + $0xb0] sm:$0xff] }
  0xac   :  { %2355 = vpow2.f32 %v2041_v54  ;;  %v293_v0 = vadd.f32 %v251_v6, %v151_v3 }
  0xad   :  { %v2047_v42 = vmul.f32 -1.442695, %v294_v5  ;;  %2357 = vpow2.f32 %v2042_v59 }
  0xae   :  { %2359 = vrcp.f32 %v452_v60  ;;  %v160_v57 = vpop.xlane.xlu1 %159  ;;  %v2046_v17 = vmul.f32 -1.442695, %v293_v0 }
  0xaf   :  { %v157_v2 = vpop.xlane.xlu0 %156  ;;  %v2344_v61 = vpop.eup %2343  ;;  %2361 = vpow2.f32 %v2047_v42  ;;  %v296_v7 = vadd.f32 %v254_v11, %v160_v57  ;;  %v272_v42 = vld [vmem:[%s3682_s2 + $0x108] sm:$0xff] }
  0xb0   :  { %661 = vperm.xlu0 %2245, %v2344_v61   ;;  %2363 = vpow2.f32 %v2044_v1  ;;  %v295_v18 = vadd.f32 %v253_v8, %v157_v2 }
  0xb1   :  { %v2346_v12 = vpop.eup %2345  ;;  %v2049_v13 = vmul.f32 -1.442695, %v296_v7  ;;  %2365 = vrcp.f32 %v454_v47 }
  0xb2   :  { %v2348_v14 = vpop.eup %2347  ;;  %v458_v15 = vadd.f32 1.0, %v2346_v12  ;;  %v166_v16 = vpop.xlane.xlu1 %165  ;;  %2367 = vrcp.f32 %v453_v62  ;;  %v2048_v31 = vmul.f32 -1.442695, %v295_v18 }
  0xb3   :  { %v163_v19 = vpop.xlane.xlu0 %162  ;;  %v2350_v20 = vpop.eup %2349  ;;  %v298_v21 = vadd.f32 %v256_v9, %v166_v16  ;;  %v455_v25 = vadd.f32 1.0, %v2348_v14  ;;  %v271_v14 = vld [vmem:[%s3682_s2 + $0x100] sm:$0xff]  ;;  %v264_v16 = vld [vmem:[%s3682_s2 + $0xc8] sm:$0xff] }
  0xb4   :  { %v2352_v22 = vpop.eup %2351  ;;  %2369 = vrcp.f32 %v458_v15  ;;  %666 = vperm.xlu1 %2246, %v2350_v20   ;;  %v297_v37 = vadd.f32 %v255_v27, %v163_v19 }
  0xb5   :  { %v2354_v24 = vpop.eup %2353  ;;  %2371 = vpow2.f32 %v2049_v13  ;;  %v2051_v26 = vmul.f32 -1.442695, %v298_v21 }
  0xb6   :  { %v2356_v28 = vpop.eup %2355  ;;  %v460_v29 = vadd.f32 1.0, %v2354_v24  ;;  %v172_v30 = vpop.xlane.xlu1 %171  ;;  %2373 = vpow2.f32 %v2046_v17  ;;  %v2050_v54 = vmul.f32 -1.442695, %v297_v37  ;;  %v263_v37 = vld [vmem:[%s3682_s2 + $0xc0] sm:$0xff] }
  0xb7   :  { %v169_v32 = vpop.xlane.xlu0 %168  ;;  %v2358_v33 = vpop.eup %2357  ;;  %2375 = vpow2.f32 %v2051_v26  ;;  %v300_v34 = vadd.f32 %v258_v23, %v172_v30  ;;  %v456_v39 = vadd.f32 1.0, %v2356_v28 }
  0xb8   :  { %v2360_v35 = vpop.eup %2359  ;;  %2377 = vrcp.f32 %v460_v29  ;;  %671 = vperm.xlu1 %2246, %v2352_v22   ;;  %v457_v44 = vadd.f32 1.0, %v2358_v33  ;;  %v299_v59 = vadd.f32 %v257_v46, %v169_v32  ;;  %v274_v29 = vld [vmem:[%s3682_s2 + $0x118] sm:$0xff] }
  0xb9   :  { %v2362_v38 = vpop.eup %2361  ;;  %2379 = vrcp.f32 %v455_v25  ;;  %v2053_v40 = vmul.f32 -1.442695, %v300_v34 }
  0xba   :  { %v2364_v41 = vpop.eup %2363  ;;  %v462_v43 = vadd.f32 1.0, %v2362_v38  ;;  %v178_v45 = vpop.xlane.xlu1 %177  ;;  %2381 = vpow2.f32 %v2048_v31  ;;  %v2052_v0 = vmul.f32 -1.442695, %v299_v59  ;;  %v276_v59 = vld [vmem:[%s3682_s2 + $0x128] sm:$0xff] }
  0xbb   :  { %v175_v49 = vpop.xlane.xlu0 %174  ;;  %2383 = vpow2.f32 %v2053_v40  ;;  %v302_v50 = vadd.f32 %v260_v36, %v178_v45  ;;  %v2366_v52 = vpop.eup %2365  ;;  %v459_v56 = vadd.f32 1.0, %v2364_v41 }
  0xbc   :  { %2385 = vrcp.f32 %v462_v43  ;;  %676 = vperm.xlu1 %2246, %v2360_v35   ;;  %v2368_v55 = vpop.eup %2367  ;;  %v301_v3 = vadd.f32 %v259_v51, %v175_v49  ;;  %v266_v43 = vld [vmem:[%s3682_s2 + $0xd8] sm:$0xff] }
  0xbd   :  { %2387 = vrcp.f32 %v456_v39  ;;  %v2055_v58 = vmul.f32 -1.442695, %v302_v50 }
  0xbe   :  { %v2370_v60 = vpop.eup %2369  ;;  %2389 = vrcp.f32 %v457_v44  ;;  %v184_v63 = vpop.xlane.xlu1 %183  ;;  %v2054_v7 = vmul.f32 -1.442695, %v301_v3 }
  0xbf   :  { %v181_v4 = vpop.xlane.xlu0 %180  ;;  %v2372_v5 = vpop.eup %2371  ;;  %2391 = vpow2.f32 %v2055_v58  ;;  %v304_v6 = vadd.f32 %v262_v53, %v184_v63  ;;  %706 = vperm.xlu0 %2245, %v2370_v60  }
  0xc0   :  { %v2374_v11 = vpop.eup %2373  ;;  %v464_v1 = vadd.f32 1.0, %v2372_v5  ;;  %681 = vperm.xlu1 %2246, %v2368_v55   ;;  %2393 = vpow2.f32 %v2050_v54  ;;  %v303_v8 = vadd.f32 %v261_v10, %v181_v4 }
  0xc1   :  { %v2376_v47 = vpop.eup %2375  ;;  %2395 = vrcp.f32 %v459_v56  ;;  %v2057_v57 = vmul.f32 -1.442695, %v304_v6  ;;  %v461_v18 = vadd.f32 1.0, %v2374_v11  ;;  %v273_v56 = vld [vmem:[%s3682_s2 + $0x110] sm:$0xff] }
  0xc2   :  { %v2378_v2 = vpop.eup %2377  ;;  %2397 = vrcp.f32 %v464_v1  ;;  %v466_v61 = vadd.f32 1.0, %v2376_v47  ;;  %v214_v62 = vpop.xlane.xlu1 %213  ;;  %v2056_v23 = vmul.f32 -1.442695, %v303_v8 }
  0xc3   :  { %v211_v9 = vpop.xlane.xlu0 %210  ;;  %v2380_v12 = vpop.eup %2379  ;;  %2399 = vpow2.f32 %v2057_v57  ;;  %v314_v13 = vadd.f32 %v272_v42, %v214_v62  ;;  %716 = vperm.xlu0 %2245, %v2378_v2   ;;  %v265_v57 = vld [vmem:[%s3682_s2 + $0xd0] sm:$0xff]  ;;  %v268_v2 = vld [vmem:[%s3682_s2 + $0xe8] sm:$0xff] }
  0xc4   :  { %v2382_v15 = vpop.eup %2381  ;;  %2401 = vrcp.f32 %v466_v61  ;;  %686 = vperm.xlu1 %2246, %v2366_v52   ;;  %v313_v24 = vadd.f32 %v271_v14, %v211_v9 }
  0xc5   :  { %v2384_v17 = vpop.eup %2383  ;;  %v2067_v19 = vmul.f32 -1.442695, %v314_v13  ;;  %2403 = vpow2.f32 %v2052_v0  ;;  %v463_v31 = vadd.f32 1.0, %v2382_v15 }
  0xc6   :  { %v2386_v20 = vpop.eup %2385  ;;  %v468_v21 = vadd.f32 1.0, %v2384_v17  ;;  %v190_v22 = vpop.xlane.xlu1 %189  ;;  %2405 = vpow2.f32 %v2054_v7  ;;  %v2066_v36 = vmul.f32 -1.442695, %v313_v24 }
  0xc7   :  { %v187_v25 = vpop.xlane.xlu0 %186  ;;  %v2388_v26 = vpop.eup %2387  ;;  %2407 = vpow2.f32 %v2067_v19  ;;  %v306_v27 = vadd.f32 %v264_v16, %v190_v22  ;;  %726 = vperm.xlu0 %2245, %v2386_v20   ;;  %v278_v20 = vld [vmem:[%s3682_s2 + $0x138] sm:$0xff] }
  0xc8   :  { %v2390_v28 = vpop.eup %2389  ;;  %2409 = vrcp.f32 %v468_v21  ;;  %691 = vperm.xlu1 %2246, %v2380_v12   ;;  %v305_v46 = vadd.f32 %v263_v37, %v187_v25 }
  0xc9   :  { %v2392_v30 = vpop.eup %2391  ;;  %2411 = vrcp.f32 %v461_v18  ;;  %v2059_v32 = vmul.f32 -1.442695, %v306_v27  ;;  %v275_v18 = vld [vmem:[%s3682_s2 + $0x120] sm:$0xff] }
  0xca   :  { %v2394_v33 = vpop.eup %2393  ;;  %v470_v34 = vadd.f32 1.0, %v2392_v30  ;;  %v220_v35 = vpop.xlane.xlu1 %219  ;;  %2413 = vpow2.f32 %v2056_v23  ;;  %v2058_v3 = vmul.f32 -1.442695, %v305_v46 }
  0xcb   :  { %v217_v38 = vpop.xlane.xlu0 %216  ;;  %v2396_v39 = vpop.eup %2395  ;;  %2415 = vpow2.f32 %v2059_v32  ;;  %v316_v40 = vadd.f32 %v274_v29, %v220_v35  ;;  %v465_v51 = vadd.f32 1.0, %v2394_v33  ;;  %v267_v29 = vld [vmem:[%s3682_s2 + $0xe0] sm:$0xff]  ;;  %v270_v33 = vld [vmem:[%s3682_s2 + $0xf8] sm:$0xff] }
  0xcc   :  { %v2398_v41 = vpop.eup %2397  ;;  %2417 = vrcp.f32 %v470_v34  ;;  %696 = vperm.xlu1 %2246, %v2388_v26   ;;  %v315_v11 = vadd.f32 %v273_v56, %v217_v38 }
  0xcd   :  { %v2400_v44 = vpop.eup %2399  ;;  %2419 = vrcp.f32 %v463_v31  ;;  %v2069_v45 = vmul.f32 -1.442695, %v316_v40  ;;  %736 = vperm.xlu0 %2245, %v2398_v41  }
  0xce   :  { %v2402_v49 = vpop.eup %2401  ;;  %v472_v50 = vadd.f32 1.0, %v2400_v44  ;;  %v196_v52 = vpop.xlane.xlu1 %195  ;;  %2421 = vpow2.f32 %v2066_v36  ;;  %v2068_v13 = vmul.f32 -1.442695, %v315_v11 }
  0xcf   :  { %v193_v53 = vpop.xlane.xlu0 %192  ;;  %v2404_v54 = vpop.eup %2403  ;;  %2423 = vpow2.f32 %v2069_v45  ;;  %v308_v55 = vadd.f32 %v266_v43, %v196_v52  ;;  %v277_v45 = vld [vmem:[%s3682_s2 + $0x130] sm:$0xff] }
  0xd0   :  { %v2406_v58 = vpop.eup %2405  ;;  %2425 = vrcp.f32 %v472_v50  ;;  %701 = vperm.xlu1 %2246, %v2390_v28   ;;  %v467_v6 = vadd.f32 1.0, %v2404_v54  ;;  %v307_v14 = vadd.f32 %v265_v57, %v193_v53 }
  0xd1   :  { %v2408_v60 = vpop.eup %2407  ;;  %v2061_v63 = vmul.f32 -1.442695, %v308_v55  ;;  %746 = vperm.xlu0 %2245, %v2402_v49   ;;  %2427 = vrcp.f32 %v465_v51  ;;  %v469_v62 = vadd.f32 1.0, %v2406_v58  ;;  %v280_v49 = vld [vmem:[%s3682_s2 + $0x148] sm:$0xff] }
  0xd2   :  { %v2410_v4 = vpop.eup %2409  ;;  %v482_v5 = vadd.f32 1.0, %v2408_v60  ;;  %v226_v10 = vpop.xlane.xlu1 %225  ;;  %v2060_v27 = vmul.f32 -1.442695, %v307_v14 }
  0xd3   :  { %v223_v1 = vpop.xlane.xlu0 %222  ;;  %v2412_v42 = vpop.eup %2411  ;;  %2429 = vpow2.f32 %v2061_v63  ;;  %v318_v47 = vadd.f32 %v276_v59, %v226_v10 }
  0xd4   :  { %v2414_v0 = vpop.eup %2413  ;;  %2431 = vrcp.f32 %v482_v5  ;;  %711 = vperm.xlu1 %2246, %v2396_v39   ;;  %v317_v28 = vadd.f32 %v275_v18, %v223_v1 }
  0xd5   :  { %v2416_v61 = vpop.eup %2415  ;;  %v2071_v7 = vmul.f32 -1.442695, %v318_v47  ;;  %756 = vperm.xlu0 %2245, %v2410_v4   ;;  %2433 = vpow2.f32 %v2058_v3  ;;  %v471_v22 = vadd.f32 1.0, %v2414_v0  ;;  %v269_v3 = vld [vmem:[%s3682_s2 + $0xf0] sm:$0xff]  ;;  %v279_v0 = vld [vmem:[%s3682_s2 + $0x140] sm:$0xff] }
  0xd6   :  { %v2418_v8 = vpop.eup %2417  ;;  %v474_v9 = vadd.f32 1.0, %v2416_v61  ;;  %2435 = vrcp.f32 %v467_v6  ;;  %v202_v12 = vpop.xlane.xlu1 %201  ;;  %v2070_v41 = vmul.f32 -1.442695, %v317_v28 }
  0xd7   :  { %v199_v15 = vpop.xlane.xlu0 %198  ;;  %v2420_v16 = vpop.eup %2419  ;;  %2437 = vpow2.f32 %v2071_v7  ;;  %v310_v17 = vadd.f32 %v268_v2, %v202_v12 }
  0xd8   :  { %v2422_v19 = vpop.eup %2421  ;;  %2439 = vrcp.f32 %v474_v9  ;;  %721 = vperm.xlu1 %2246, %v2412_v42   ;;  %v309_v37 = vadd.f32 %v267_v29, %v199_v15 }
  0xd9   :  { %v2424_v21 = vpop.eup %2423  ;;  %2441 = vrcp.f32 %v469_v62  ;;  %v2063_v23 = vmul.f32 -1.442695, %v310_v17  ;;  %766 = vperm.xlu0 %2245, %v2418_v8   ;;  %v481_v35 = vadd.f32 1.0, %v2422_v19 }
  0xda   :  { %v2426_v24 = vpop.eup %2425  ;;  %v484_v25 = vadd.f32 1.0, %v2424_v21  ;;  %v232_v26 = vpop.xlane.xlu1 %231  ;;  %2443 = vpow2.f32 %v2068_v13  ;;  %v2062_v52 = vmul.f32 -1.442695, %v309_v37 }
  0xdb   :  { %2445 = vpow2.f32 %v2063_v23  ;;  %v320_v30 = vadd.f32 %v278_v20, %v232_v26  ;;  %v229_v31 = vpop.xlane.xlu0 %228  ;;  %v2428_v32 = vpop.eup %2427 }
  0xdc   :  { %2447 = vrcp.f32 %v484_v25  ;;  %731 = vperm.xlu1 %2246, %v2420_v16   ;;  %v319_v59 = vadd.f32 %v277_v45, %v229_v31  ;;  %v575_v45 = vld [vmem:[%s3684_s3] sm:$0xff] }
  0xdd   :  { %v2430_v34 = vpop.eup %2429  ;;  %2449 = vrcp.f32 %v471_v22  ;;  %v2073_v36 = vmul.f32 -1.442695, %v320_v30  ;;  %776 = vperm.xlu0 %2245, %v2426_v24  }
  0xde   :  { %v2432_v38 = vpop.eup %2431  ;;  %v476_v39 = vadd.f32 1.0, %v2430_v34  ;;  %v208_v40 = vpop.xlane.xlu1 %207  ;;  %2451 = vpow2.f32 %v2060_v27  ;;  %v2072_v1 = vmul.f32 -1.442695, %v319_v59 }
  0xdf   :  { %v2434_v43 = vpop.eup %2433  ;;  %2453 = vpow2.f32 %v2073_v36  ;;  %v312_v44 = vadd.f32 %v270_v33, %v208_v40  ;;  %v205_v53 = vpop.xlane.xlu0 %204 }
  0xe0   :  { %v2436_v46 = vpop.eup %2435  ;;  %2455 = vrcp.f32 %v476_v39  ;;  %741 = vperm.xlu1 %2246, %v2428_v32   ;;  %v473_v56 = vadd.f32 1.0, %v2434_v43  ;;  %v311_v42 = vadd.f32 %v269_v3, %v205_v53  ;;  %v580_v3 = vld [vmem:[%s3684_s3 + $0x28] sm:$0xff] }
  0xe1   :  { %v2438_v50 = vpop.eup %2437  ;;  %2457 = vrcp.f32 %v481_v35  ;;  %v2065_v51 = vmul.f32 -1.442695, %v312_v44  ;;  %826 = vperm.xlu0 %2245, %v2432_v38   ;;  %v2249_v44 = vld [vmem:[%s3683_s4 + $0x4] ss:$12 sps:$4 sm:$0xff]  }
  0xe2   :  { %v2440_v54 = vpop.eup %2439  ;;  %v486_v55 = vadd.f32 1.0, %v2438_v50  ;;  %v238_v58 = vpop.xlane.xlu1 %237  ;;  %2459 = vpow2.f32 %v2070_v41  ;;  %v2064_v9 = vmul.f32 -1.442695, %v311_v42  ;;  %1490 = vmatprep.mubr.bf16.mxu1 %v2249_v44  ;;  %v578_v50 = vld [vmem:[%s3684_s3 + $0x18] sm:$0xff] }
  0xe3   :  { %v2442_v60 = vpop.eup %2441  ;;  %2461 = vpow2.f32 %v2065_v51  ;;  %v322_v63 = vadd.f32 %v280_v49, %v238_v58  ;;  %v235_v2 = vpop.xlane.xlu0 %234  ;;  %v577_v49 = vld [vmem:[%s3684_s3 + $0x10] sm:$0xff] }
  0xe4   :  { %v2444_v4 = vpop.eup %2443  ;;  %2463 = vrcp.f32 %v486_v55  ;;  %751 = vperm.xlu1 %2246, %v2436_v46   ;;  %v321_v12 = vadd.f32 %v279_v0, %v235_v2  ;;  %v576_v46 = vld [vmem:[%s3684_s3 + $0x8] sm:$0xff] }
  0xe5   :  { %v2446_v5 = vpop.eup %2445  ;;  %v2075_v6 = vmul.f32 -1.442695, %v322_v63  ;;  %786 = vperm.xlu0 %2245, %v2440_v54   ;;  %2465 = vpow2.f32 %v2062_v52  ;;  %v483_v57 = vadd.f32 1.0, %v2444_v4  ;;  %v579_v63 = vld [vmem:[%s3684_s3 + $0x20] sm:$0xff]  ;;  %v581_v4 = vld [vmem:[%s3684_s3 + $0x30] sm:$0xff] }
  0xe6   :  { %v2448_v10 = vpop.eup %2447  ;;  %v478_v11 = vadd.f32 1.0, %v2446_v5  ;;  %2467 = vrcp.f32 %v473_v56  ;;  %v2074_v19 = vmul.f32 -1.442695, %v321_v12  ;;  %v582_v5 = vld [vmem:[%s3684_s3 + $0x38] sm:$0xff] }
  0xe7   :  { %v2450_v47 = vpop.eup %2449  ;;  %2469 = vpow2.f32 %v2075_v6 }
  0xe8   :  { %v2452_v61 = vpop.eup %2451  ;;  %2471 = vrcp.f32 %v478_v11  ;;  %761 = vperm.xlu1 %2246, %v2442_v60  }
  0xe9   :  { %v2454_v62 = vpop.eup %2453  ;;  %836 = vperm.xlu0 %2245, %v2448_v10   ;;  %2473 = vpow2.f32 %v2072_v1  ;;  %v475_v14 = vadd.f32 1.0, %v2452_v61  ;;  %v583_v61 = vld [vmem:[%s3684_s3 + $0x40] sm:$0xff] }
  0xea   :  { %v2456_v7 = vpop.eup %2455  ;;  %v488_v8 = vadd.f32 1.0, %v2454_v62  ;;  %2475 = vrcp.f32 %v483_v57  ;;  %v584_v62 = vld [vmem:[%s3684_s3 + $0x48] sm:$0xff] }
  0xeb   :  { %v2458_v13 = vpop.eup %2457 }
  0xec   :  { %v2460_v15 = vpop.eup %2459  ;;  %2477 = vrcp.f32 %v488_v8  ;;  %771 = vperm.xlu1 %2246, %v2450_v47   ;;  %v586_v8 = vld [vmem:[%s3684_s3 + $0x58] sm:$0xff] }
  0xed   :  { %v2462_v16 = vpop.eup %2461  ;;  %796 = vperm.xlu0 %2245, %v2456_v7   ;;  %2479 = vpow2.f32 %v2064_v9  ;;  %v485_v21 = vadd.f32 1.0, %v2460_v15  ;;  %v585_v7 = vld [vmem:[%s3684_s3 + $0x50] sm:$0xff] }
  0xee   :  { %v2464_v17 = vpop.eup %2463  ;;  %v480_v18 = vadd.f32 1.0, %v2462_v16  ;;  %2481 = vrcp.f32 %v475_v14 }
  0xef   :  { %v2466_v20 = vpop.eup %2465 }
  0xf0   :  { %v2468_v22 = vpop.eup %2467  ;;  %2483 = vrcp.f32 %v480_v18  ;;  %821 = vperm.xlu1 %2246, %v2458_v13   ;;  %v477_v26 = vadd.f32 1.0, %v2466_v20 }
  0xf1   :  { %v2470_v23 = vpop.eup %2469  ;;  %846 = vperm.xlu0 %2245, %v2464_v17   ;;  %2485 = vpow2.f32 %v2074_v19 }
  0xf2   :  { %v2472_v24 = vpop.eup %2471  ;;  %v490_v25 = vadd.f32 1.0, %v2470_v23  ;;  %2487 = vrcp.f32 %v485_v21  ;;  %v587_v21 = vld [vmem:[%s3684_s3 + $0x60] sm:$0xff]  ;;  %v589_v23 = vld [vmem:[%s3684_s3 + $0x70] sm:$0xff] }
  0xf3   :  { %v2474_v27 = vpop.eup %2473 }
  0xf4   :  { %2489 = vrcp.f32 %v490_v25  ;;  %781 = vperm.xlu1 %2246, %v2468_v22   ;;  %v2476_v28 = vpop.eup %2475  ;;  %v487_v30 = vadd.f32 1.0, %v2474_v27  ;;  %v588_v22 = vld [vmem:[%s3684_s3 + $0x68] sm:$0xff] }
  0xf5   :  { %806 = vperm.xlu0 %2245, %v2472_v24   ;;  %2491 = vrcp.f32 %v477_v26  ;;  %v590_v24 = vld [vmem:[%s3684_s3 + $0x78] sm:$0xff]  ;;  %v593_v26 = vld [vmem:[%s3684_s3 + $0x90] sm:$0xff] }
  0xf6   :  { %v2478_v29 = vpop.eup %2477  ;;  %2493 = vrcp.f32 %v487_v30 }
  0xf7   :  { %v2480_v31 = vpop.eup %2479 }
  0xf8   :  { %831 = vperm.xlu1 %2246, %v2476_v28   ;;  %v2482_v32 = vpop.eup %2481  ;;  %v479_v34 = vadd.f32 1.0, %v2480_v31 }
  0xf9   :  { %856 = vperm.xlu0 %2245, %v2478_v29  }
  0xfa   :  { %v2484_v33 = vpop.eup %2483  ;;  %2495 = vrcp.f32 %v479_v34  ;;  %v592_v34 = vld [vmem:[%s3684_s3 + $0x88] sm:$0xff] }
  0xfb   :  { %v2486_v35 = vpop.eup %2485 }
  0xfc   :  { %791 = vperm.xlu1 %2246, %v2482_v32   ;;  %v2488_v36 = vpop.eup %2487  ;;  %v489_v38 = vadd.f32 1.0, %v2486_v35  ;;  %v594_v32 = vld [vmem:[%s3684_s3 + $0x98] sm:$0xff] }
  0xfd   :  { %816 = vperm.xlu0 %2245, %v2484_v33   ;;  %v591_v33 = vld [vmem:[%s3684_s3 + $0x80] sm:$0xff] }
  0xfe   :  { %v2490_v37 = vpop.eup %2489  ;;  %2497 = vrcp.f32 %v489_v38 }
  0xff   :  { %v2492_v39 = vpop.eup %2491 }
 0x100   :  { %841 = vperm.xlu1 %2246, %v2488_v36   ;;  %v2494_v40 = vpop.eup %2493 }
 0x101   :  { %866 = vperm.xlu0 %2245, %v2490_v37  }
 0x104   :  { %801 = vperm.xlu1 %2246, %v2492_v39   ;;  %v2496_v41 = vpop.eup %2495 }
 0x108   :  { %851 = vperm.xlu1 %2246, %v2494_v40   ;;  %v2498_v43 = vpop.eup %2497  ;;  %v597_v40 = vld [vmem:[%s3684_s3 + $0xb0] sm:$0xff] }
 0x10c   :  { %811 = vperm.xlu1 %2246, %v2496_v41  }
 0x110   :  { %861 = vperm.xlu1 %2246, %v2498_v43  }
 0x12f   :  { %v662_v51 = vpop.permute.xlu0 %661 }
 0x130   :  { %v869_v53 = vmul.f32 %v662_v51, %v575_v45  ;;  %v870_v54 = vmul.f32 %v662_v51, %v576_v46  ;;  %v598_v45 = vld [vmem:[%s3684_s3 + $0xb8] sm:$0xff]  ;;  %v595_v46 = vld [vmem:[%s3684_s3 + $0xa0] sm:$0xff] }
 0x133   :  { %v667_v52 = vpop.permute.xlu1 %666 }
 0x134   :  { %v871_v55 = vmul.f32 %v667_v52, %v577_v49  ;;  %v872_v56 = vmul.f32 %v667_v52, %v578_v50  ;;  %v596_v49 = vld [vmem:[%s3684_s3 + $0xa8] sm:$0xff] }
 0x136   :  { %v954_v58 = vpack.c.bf16 %v872_v56, %v870_v54  ;;  %v953_v59 = vpack.c.bf16 %v871_v55, %v869_v53  ;;  %v601_v55 = vld [vmem:[%s3684_s3 + $0xd0] sm:$0xff] }
 0x137   :  { %v672_v60 = vpop.permute.xlu1 %671 }
 0x138   :  { %1458 = vmatprep.subr.bf16.mxu1 %v954_v58  ;;  %v873_v10 = vmul.f32 %v672_v60, %v579_v63  ;;  %v874_v11 = vmul.f32 %v672_v60, %v580_v3  ;;  %v602_v60 = vld [vmem:[%s3684_s3 + $0xd8] sm:$0xff]  ;;  %v599_v63 = vld [vmem:[%s3684_s3 + $0xc0] sm:$0xff]  ;;  %v600_v3 = vld [vmem:[%s3684_s3 + $0xc8] sm:$0xff] }
 0x139   :  { %1459 = vmatpush1.bf16.msra.mxu1 %v953_v59 }
 0x13b   :  { %v677_v6 = vpop.permute.xlu1 %676 }
 0x13c   :  { %v875_v1 = vmul.f32 %v677_v6, %v581_v4  ;;  %v876_v42 = vmul.f32 %v677_v6, %v582_v5 }
 0x13e   :  { %v955_v47 = vpack.c.bf16 %v875_v1, %v873_v10  ;;  %v956_v57 = vpack.c.bf16 %v876_v42, %v874_v11  ;;  %v707_v0 = vpop.permute.xlu0 %706  ;;  %v605_v1 = vld [vmem:[%s3684_s3 + $0xf0] sm:$0xff] }
 0x13f   :  { %v682_v2 = vpop.permute.xlu1 %681  ;;  %v887_v38 = vmul.f32 %v707_v0, %v593_v26  ;;  %v888_v39 = vmul.f32 %v707_v0, %v594_v32  ;;  %v606_v0 = vld [vmem:[%s3684_s3 + $0xf8] sm:$0xff] }
 0x140   :  { %1460 = vmatprep.subr.bf16.mxu1 %v956_v57  ;;  %v877_v13 = vmul.f32 %v682_v2, %v583_v61  ;;  %v878_v14 = vmul.f32 %v682_v2, %v584_v62  ;;  %v603_v2 = vld [vmem:[%s3684_s3 + $0xe0] sm:$0xff]  ;;  %v604_v61 = vld [vmem:[%s3684_s3 + $0xe8] sm:$0xff] }
 0x141   :  { %1461 = vmatpush1.bf16.msra.mxu1 %v955_v47 }
 0x142   :  { %v717_v9 = vpop.permute.xlu0 %716 }
 0x143   :  { %v687_v12 = vpop.permute.xlu1 %686  ;;  %v891_v53 = vmul.f32 %v717_v9, %v597_v40  ;;  %v892_v54 = vmul.f32 %v717_v9, %v598_v45 }
 0x144   :  { %v879_v15 = vmul.f32 %v687_v12, %v585_v7  ;;  %v880_v16 = vmul.f32 %v687_v12, %v586_v8 }
 0x146   :  { %v957_v17 = vpack.c.bf16 %v879_v15, %v877_v13  ;;  %v958_v18 = vpack.c.bf16 %v880_v16, %v878_v14  ;;  %v727_v19 = vpop.permute.xlu0 %726  ;;  %v609_v13 = vld [vmem:[%s3684_s3 + $0x110] sm:$0xff] }
 0x147   :  { %v692_v20 = vpop.permute.xlu1 %691  ;;  %v895_v10 = vmul.f32 %v727_v19, %v601_v55  ;;  %v896_v11 = vmul.f32 %v727_v19, %v602_v60  ;;  %v608_v19 = vld [vmem:[%s3684_s3 + $0x108] sm:$0xff]  ;;  %v622_v55 = vld [vmem:[%s3684_s3 + $0x178] sm:$0xff] }
 0x148   :  { %1462 = vmatprep.subr.bf16.mxu1 %v958_v18  ;;  %v881_v27 = vmul.f32 %v692_v20, %v587_v21  ;;  %v882_v28 = vmul.f32 %v692_v20, %v588_v22  ;;  %v607_v18 = vld [vmem:[%s3684_s3 + $0x100] sm:$0xff] }
 0x149   :  { %1463 = vmatpush1.bf16.msra.mxu1 %v957_v17  ;;  %v610_v17 = vld [vmem:[%s3684_s3 + $0x118] sm:$0xff] }
 0x14b   :  { %v697_v25 = vpop.permute.xlu1 %696 }
 0x14c   :  { %v883_v29 = vmul.f32 %v697_v25, %v589_v23  ;;  %v884_v30 = vmul.f32 %v697_v25, %v590_v24  ;;  %v737_v31 = vpop.permute.xlu0 %736  ;;  %v613_v25 = vld [vmem:[%s3684_s3 + $0x130] sm:$0xff] }
 0x14d   :  { %v899_v9 = vmul.f32 %v737_v31, %v605_v1  ;;  %v900_v12 = vmul.f32 %v737_v31, %v606_v0  ;;  %v612_v31 = vld [vmem:[%s3684_s3 + $0x128] sm:$0xff]  ;;  %v642_v1 = vld [vmem:[%s3684_s3 + $0x218] sm:$0xff] }
 0x14e   :  { %v959_v35 = vpack.c.bf16 %v883_v29, %v881_v27  ;;  %v960_v36 = vpack.c.bf16 %v884_v30, %v882_v28  ;;  %v614_v29 = vld [vmem:[%s3684_s3 + $0x138] sm:$0xff]  ;;  %v611_v30 = vld [vmem:[%s3684_s3 + $0x120] sm:$0xff] }
 0x14f   :  { %v702_v37 = vpop.permute.xlu1 %701 }
 0x150   :  { %v885_v41 = vmul.f32 %v702_v37, %v591_v33  ;;  %v886_v43 = vmul.f32 %v702_v37, %v592_v34  ;;  %v747_v44 = vpop.permute.xlu0 %746  ;;  %1464 = vmatprep.subr.bf16.mxu1 %v960_v36  ;;  %v617_v37 = vld [vmem:[%s3684_s3 + $0x150] sm:$0xff] }
 0x151   :  { %1465 = vmatpush1.bf16.msra.mxu1 %v959_v35  ;;  %v903_v23 = vmul.f32 %v747_v44, %v609_v13  ;;  %v904_v24 = vmul.f32 %v747_v44, %v610_v17  ;;  %v616_v44 = vld [vmem:[%s3684_s3 + $0x148] sm:$0xff]  ;;  %v626_v13 = vld [vmem:[%s3684_s3 + $0x198] sm:$0xff] }
 0x152   :  { %v961_v50 = vpack.c.bf16 %v887_v38, %v885_v41  ;;  %v962_v51 = vpack.c.bf16 %v888_v39, %v886_v43  ;;  %v618_v41 = vld [vmem:[%s3684_s3 + $0x158] sm:$0xff]  ;;  %v615_v43 = vld [vmem:[%s3684_s3 + $0x140] sm:$0xff] }
 0x153   :  { %v712_v52 = vpop.permute.xlu1 %711 }
 0x154   :  { %v889_v56 = vmul.f32 %v712_v52, %v595_v46  ;;  %v890_v58 = vmul.f32 %v712_v52, %v596_v49  ;;  %v757_v59 = vpop.permute.xlu0 %756  ;;  %1466 = vmatprep.subr.bf16.mxu1 %v962_v51  ;;  %v621_v52 = vld [vmem:[%s3684_s3 + $0x170] sm:$0xff] }
 0x155   :  { %1467 = vmatpush1.bf16.msra.mxu1 %v961_v50  ;;  %v907_v35 = vmul.f32 %v757_v59, %v613_v25  ;;  %v908_v36 = vmul.f32 %v757_v59, %v614_v29  ;;  %v620_v59 = vld [vmem:[%s3684_s3 + $0x168] sm:$0xff] }
 0x156   :  { %v963_v4 = vpack.c.bf16 %v891_v53, %v889_v56  ;;  %v964_v5 = vpack.c.bf16 %v892_v54, %v890_v58  ;;  %v619_v58 = vld [vmem:[%s3684_s3 + $0x160] sm:$0xff] }
 0x157   :  { %v722_v6 = vpop.permute.xlu1 %721 }
 0x158   :  { %v893_v42 = vmul.f32 %v722_v6, %v599_v63  ;;  %v894_v47 = vmul.f32 %v722_v6, %v600_v3  ;;  %v767_v57 = vpop.permute.xlu0 %766  ;;  %1468 = vmatprep.subr.bf16.mxu1 %v964_v5  ;;  %v641_v6 = vld [vmem:[%s3684_s3 + $0x210] sm:$0xff] }
 0x159   :  { %1469 = vmatpush1.bf16.msra.mxu1 %v963_v4  ;;  %v911_v50 = vmul.f32 %v767_v57, %v617_v37  ;;  %v912_v51 = vmul.f32 %v767_v57, %v618_v41  ;;  %v627_v37 = vld [vmem:[%s3684_s3 + $0x1a0] sm:$0xff] }
 0x15a   :  { %v965_v62 = vpack.c.bf16 %v895_v10, %v893_v42  ;;  %v966_v7 = vpack.c.bf16 %v896_v11, %v894_v47  ;;  %v639_v42 = vld [vmem:[%s3684_s3 + $0x200] sm:$0xff]  ;;  %v640_v47 = vld [vmem:[%s3684_s3 + $0x208] sm:$0xff] }
 0x15b   :  { %v732_v8 = vpop.permute.xlu1 %731 }
 0x15c   :  { %v897_v14 = vmul.f32 %v732_v8, %v603_v2  ;;  %v898_v15 = vmul.f32 %v732_v8, %v604_v61  ;;  %v777_v16 = vpop.permute.xlu0 %776  ;;  %1470 = vmatprep.subr.bf16.mxu1 %v966_v7  ;;  %v625_v8 = vld [vmem:[%s3684_s3 + $0x190] sm:$0xff] }
 0x15d   :  { %1471 = vmatpush1.bf16.msra.mxu1 %v965_v62  ;;  %v915_v4 = vmul.f32 %v777_v16, %v621_v52  ;;  %v916_v5 = vmul.f32 %v777_v16, %v622_v55  ;;  %v647_v52 = vld [vmem:[%s3684_s3 + $0x240] sm:$0xff] }
 0x15e   :  { %v967_v20 = vpack.c.bf16 %v899_v9, %v897_v14  ;;  %v968_v21 = vpack.c.bf16 %v900_v12, %v898_v15  ;;  %v623_v14 = vld [vmem:[%s3684_s3 + $0x180] sm:$0xff]  ;;  %v624_v15 = vld [vmem:[%s3684_s3 + $0x188] sm:$0xff] }
 0x15f   :  { %v742_v22 = vpop.permute.xlu1 %741 }
 0x160   :  { %v901_v26 = vmul.f32 %v742_v22, %v607_v18  ;;  %v902_v27 = vmul.f32 %v742_v22, %v608_v19  ;;  %v827_v28 = vpop.permute.xlu0 %826  ;;  %1472 = vmatprep.subr.bf16.mxu1 %v968_v21  ;;  %v645_v21 = vld [vmem:[%s3684_s3 + $0x230] sm:$0xff] }
 0x161   :  { %1473 = vmatpush1.bf16.msra.mxu1 %v967_v20  ;;  %v935_v62 = vmul.f32 %v827_v28, %v641_v6  ;;  %v936_v7 = vmul.f32 %v827_v28, %v642_v1  ;;  %v631_v6 = vld [vmem:[%s3684_s3 + $0x1c0] sm:$0xff] }
 0x162   :  { %v969_v32 = vpack.c.bf16 %v903_v23, %v901_v26  ;;  %v970_v33 = vpack.c.bf16 %v904_v24, %v902_v27  ;;  %v646_v24 = vld [vmem:[%s3684_s3 + $0x238] sm:$0xff]  ;;  %v643_v26 = vld [vmem:[%s3684_s3 + $0x220] sm:$0xff]  ;;  %v644_v27 = vld [vmem:[%s3684_s3 + $0x228] sm:$0xff] }
 0x163   :  { %v752_v34 = vpop.permute.xlu1 %751 }
 0x164   :  { %v905_v38 = vmul.f32 %v752_v34, %v611_v30  ;;  %v906_v39 = vmul.f32 %v752_v34, %v612_v31  ;;  %v787_v40 = vpop.permute.xlu0 %786  ;;  %1474 = vmatprep.subr.bf16.mxu1 %v970_v33  ;;  %v629_v33 = vld [vmem:[%s3684_s3 + $0x1b0] sm:$0xff] }
 0x165   :  { %1475 = vmatpush1.bf16.msra.mxu1 %v969_v32  ;;  %v919_v19 = vmul.f32 %v787_v40, %v625_v8  ;;  %v920_v20 = vmul.f32 %v787_v40, %v626_v13  ;;  %v652_v8 = vld [vmem:[%s3684_s3 + $0x268] sm:$0xff] }
 0x166   :  { %v971_v45 = vpack.c.bf16 %v907_v35, %v905_v38  ;;  %v972_v46 = vpack.c.bf16 %v908_v36, %v906_v39  ;;  %v630_v36 = vld [vmem:[%s3684_s3 + $0x1b8] sm:$0xff]  ;;  %v628_v38 = vld [vmem:[%s3684_s3 + $0x1a8] sm:$0xff] }
 0x167   :  { %v762_v49 = vpop.permute.xlu1 %761 }
 0x168   :  { %v909_v53 = vmul.f32 %v762_v49, %v615_v43  ;;  %v910_v54 = vmul.f32 %v762_v49, %v616_v44  ;;  %1476 = vmatprep.subr.bf16.mxu1 %v972_v46  ;;  %v837_v56 = vpop.permute.xlu0 %836  ;;  %v649_v46 = vld [vmem:[%s3684_s3 + $0x250] sm:$0xff] }
 0x169   :  { %1477 = vmatpush1.bf16.msra.mxu1 %v971_v45  ;;  %v939_v31 = vmul.f32 %v837_v56, %v645_v21  ;;  %v940_v32 = vmul.f32 %v837_v56, %v646_v24  ;;  %v635_v21 = vld [vmem:[%s3684_s3 + $0x1e0] sm:$0xff] }
 0x16a   :  { %v973_v60 = vpack.c.bf16 %v911_v50, %v909_v53  ;;  %v974_v63 = vpack.c.bf16 %v912_v51, %v910_v54  ;;  %v650_v51 = vld [vmem:[%s3684_s3 + $0x258] sm:$0xff]  ;;  %v648_v53 = vld [vmem:[%s3684_s3 + $0x248] sm:$0xff] }
 0x16b   :  { %v772_v3 = vpop.permute.xlu1 %771 }
 0x16c   :  { %v913_v10 = vmul.f32 %v772_v3, %v619_v58  ;;  %v914_v11 = vmul.f32 %v772_v3, %v620_v59  ;;  %1478 = vmatprep.subr.bf16.mxu1 %v974_v63  ;;  %v797_v2 = vpop.permute.xlu0 %796 }
 0x16d   :  { %1479 = vmatpush1.bf16.msra.mxu1 %v973_v60  ;;  %v923_v44 = vmul.f32 %v797_v2, %v629_v33  ;;  %v924_v45 = vmul.f32 %v797_v2, %v630_v36  ;;  %v633_v60 = vld [vmem:[%s3684_s3 + $0x1d0] sm:$0xff]  ;;  %v655_v33 = vld [vmem:[%s3684_s3 + $0x280] sm:$0xff] }
 0x16e   :  { %v975_v57 = vpack.c.bf16 %v915_v4, %v913_v10  ;;  %v976_v0 = vpack.c.bf16 %v916_v5, %v914_v11  ;;  %v634_v4 = vld [vmem:[%s3684_s3 + $0x1d8] sm:$0xff]  ;;  %v632_v10 = vld [vmem:[%s3684_s3 + $0x1c8] sm:$0xff] }
 0x16f   :  { %v822_v61 = vpop.permute.xlu1 %821 }
 0x170   :  { %v933_v9 = vmul.f32 %v822_v61, %v639_v42  ;;  %v934_v12 = vmul.f32 %v822_v61, %v640_v47  ;;  %1480 = vmatprep.subr.bf16.mxu1 %v976_v0  ;;  %v847_v25 = vpop.permute.xlu0 %846  ;;  %v653_v0 = vld [vmem:[%s3684_s3 + $0x270] sm:$0xff] }
 0x171   :  { %1481 = vmatpush1.bf16.msra.mxu1 %v975_v57  ;;  %v943_v58 = vmul.f32 %v847_v25, %v649_v46  ;;  %v944_v59 = vmul.f32 %v847_v25, %v650_v51  ;;  %v2255_v51 = vld [vmem:[%s3683_s4 + $0x34] ss:$12 sps:$4 sm:$0xff]  }
 0x172   :  { %v986_v16 = vpack.c.bf16 %v936_v7, %v934_v12  ;;  %v985_v17 = vpack.c.bf16 %v935_v62, %v933_v9  ;;  %v654_v62 = vld [vmem:[%s3684_s3 + $0x278] sm:$0xff]  ;;  %v651_v7 = vld [vmem:[%s3684_s3 + $0x260] sm:$0xff] }
 0x173   :  { %v782_v18 = vpop.permute.xlu1 %781 }
 0x174   :  { %v917_v22 = vmul.f32 %v782_v18, %v623_v14  ;;  %v918_v23 = vmul.f32 %v782_v18, %v624_v15  ;;  %1701 = vmatprep.subr.bf16.mxu0 %v986_v16  ;;  %v807_v41 = vpop.permute.xlu0 %806 }
 0x175   :  { %1702 = vmatpush1.bf16.msra.mxu0 %v985_v17  ;;  %v927_v47 = vmul.f32 %v807_v41, %v633_v60  ;;  %v928_v57 = vmul.f32 %v807_v41, %v634_v4  ;;  %v637_v17 = vld [vmem:[%s3684_s3 + $0x1f0] sm:$0xff]  ;;  %v2265_v60 = vld [vmem:[%s3683_s4 + $0x60] ss:$12 sps:$4 sm:$0xff]   ;;  %v2269_v4 = vld [vmem:[%s3683_s4 + $0x78] ss:$12 sps:$4 sm:$0xff]  }
 0x176   :  { %v977_v28 = vpack.c.bf16 %v919_v19, %v917_v22  ;;  %v978_v29 = vpack.c.bf16 %v920_v20, %v918_v23  ;;  %v638_v20 = vld [vmem:[%s3684_s3 + $0x1f8] sm:$0xff]  ;;  %v636_v22 = vld [vmem:[%s3684_s3 + $0x1e8] sm:$0xff] }
 0x177   :  { %v832_v30 = vpop.permute.xlu1 %831 }
 0x178   :  { %v937_v34 = vmul.f32 %v832_v30, %v643_v26  ;;  %v938_v35 = vmul.f32 %v832_v30, %v644_v27  ;;  %1482 = vmatprep.subr.bf16.mxu1 %v978_v29  ;;  %v857_v5 = vpop.permute.xlu0 %856 }
 0x179   :  { %1483 = vmatpush1.bf16.msra.mxu1 %v977_v28  ;;  %v947_v15 = vmul.f32 %v857_v5, %v653_v0  ;;  %v948_v16 = vmul.f32 %v857_v5, %v654_v62  ;;  %v657_v28 = vld [vmem:[%s3684_s3 + $0x290] sm:$0xff]  ;;  %v2281_v0 = vld [vmem:[%s3683_s4 + $0xc0] ss:$12 sps:$4 sm:$0xff]   ;;  %v2285_v62 = vld [vmem:[%s3683_s4 + $0xd8] ss:$12 sps:$4 sm:$0xff]  }
 0x17a   :  { %v987_v39 = vpack.c.bf16 %v939_v31, %v937_v34  ;;  %v988_v40 = vpack.c.bf16 %v940_v32, %v938_v35  ;;  %v658_v31 = vld [vmem:[%s3684_s3 + $0x298] sm:$0xff]  ;;  %v656_v34 = vld [vmem:[%s3684_s3 + $0x288] sm:$0xff]  ;;  %v2271_v5 = vld [vmem:[%s3683_s4 + $0x94] ss:$12 sps:$4 sm:$0xff]  }
 0x17b   :  { %v792_v43 = vpop.permute.xlu1 %791 }
 0x17c   :  { %v921_v49 = vmul.f32 %v792_v43, %v627_v37  ;;  %v922_v50 = vmul.f32 %v792_v43, %v628_v38  ;;  %1703 = vmatprep.subr.bf16.mxu0 %v988_v40  ;;  %v817_v13 = vpop.permute.xlu0 %816  ;;  %v2247_v43 = vld [vmem:[%s3683_s4] ss:$12 sps:$4 sm:$0xff]  }
 0x17d   :  { %1704 = vmatpush1.bf16.msra.mxu0 %v987_v39  ;;  %v931_v26 = vmul.f32 %v817_v13, %v637_v17  ;;  %v932_v27 = vmul.f32 %v817_v13, %v638_v20  ;;  %v2290_v13 = vld [vmem:[%s3683_s4 + $0xf8] ss:$12 sps:$4 sm:$0xff]   ;;  %v2297_v17 = vld [vmem:[%s3683_s4 + $0x120] ss:$12 sps:$4 sm:$0xff]  }
 0x17e   :  { %v979_v54 = vpack.c.bf16 %v923_v44, %v921_v49  ;;  %v980_v55 = vpack.c.bf16 %v924_v45, %v922_v50  ;;  %v2251_v44 = vld [vmem:[%s3683_s4 + $0x1c] ss:$12 sps:$4 sm:$0xff]   ;;  %v2253_v50 = vld [vmem:[%s3683_s4 + $0x18] ss:$12 sps:$4 sm:$0xff]  }
 0x17f   :  { %v842_v56 = vpop.permute.xlu1 %841  ;;  %v2250_v49 = vld [vmem:[%s3683_s4 + $0x8] ss:$12 sps:$4 sm:$0xff]   ;;  %v2301_v20 = vld [vmem:[%s3683_s4 + $0x138] ss:$12 sps:$4 sm:$0xff]  }
 0x180   :  { %v941_v63 = vmul.f32 %v842_v56, %v647_v52  ;;  %v942_v3 = vmul.f32 %v842_v56, %v648_v53  ;;  %1484 = vmatprep.subr.bf16.mxu1 %v980_v55  ;;  %v867_v32 = vpop.permute.xlu0 %866  ;;  %v2254_v52 = vld [vmem:[%s3683_s4 + $0x20] ss:$12 sps:$4 sm:$0xff]   ;;  %v2257_v53 = vld [vmem:[%s3683_s4 + $0x30] ss:$12 sps:$4 sm:$0xff]   ;;  %v2258_v55 = vld [vmem:[%s3683_s4 + $0x38] ss:$12 sps:$4 sm:$0xff]  }
 0x181   :  { %1485 = vmatpush1.bf16.msra.mxu1 %v979_v54  ;;  %v951_v38 = vmul.f32 %v867_v32, %v657_v28  ;;  %v952_v39 = vmul.f32 %v867_v32, %v658_v31  ;;  %v2259_v54 = vld [vmem:[%s3683_s4 + $0x4c] ss:$12 sps:$4 sm:$0xff]   ;;  %v2261_v56 = vld [vmem:[%s3683_s4 + $0x48] ss:$12 sps:$4 sm:$0xff]   ;;  %v2310_v28 = vld [vmem:[%s3683_s4 + $0x170] ss:$12 sps:$4 sm:$0xff]  }
 0x182   :  { %v989_v11 = vpack.c.bf16 %v943_v58, %v941_v63  ;;  %v990_v1 = vpack.c.bf16 %v944_v59, %v942_v3  ;;  %v2263_v58 = vld [vmem:[%s3683_s4 + $0x64] ss:$12 sps:$4 sm:$0xff]   ;;  %v2267_v63 = vld [vmem:[%s3683_s4 + $0x7c] ss:$12 sps:$4 sm:$0xff]  }
 0x183   :  { %v802_v42 = vpop.permute.xlu1 %801  ;;  %v2262_v59 = vld [vmem:[%s3683_s4 + $0x50] ss:$12 sps:$4 sm:$0xff]   ;;  %v2266_v3 = vld [vmem:[%s3683_s4 + $0x68] ss:$12 sps:$4 sm:$0xff]   ;;  %v2317_v32 = vld [vmem:[%s3683_s4 + $0x198] ss:$12 sps:$4 sm:$0xff]  }
 0x184   :  { %v925_v2 = vmul.f32 %v802_v42, %v631_v6  ;;  %v926_v61 = vmul.f32 %v802_v42, %v632_v10  ;;  %1705 = vmatprep.subr.bf16.mxu0 %v990_v1  ;;  %v2270_v6 = vld [vmem:[%s3683_s4 + $0x80] ss:$12 sps:$4 sm:$0xff]   ;;  %v2273_v10 = vld [vmem:[%s3683_s4 + $0x90] ss:$12 sps:$4 sm:$0xff]   ;;  %v2274_v1 = vld [vmem:[%s3683_s4 + $0x98] ss:$12 sps:$4 sm:$0xff]  }
 0x185   :  { %1706 = vmatpush1.bf16.msra.mxu0 %v989_v11  ;;  %v2275_v11 = vld [vmem:[%s3683_s4 + $0xac] ss:$12 sps:$4 sm:$0xff]   ;;  %v2277_v42 = vld [vmem:[%s3683_s4 + $0xa8] ss:$12 sps:$4 sm:$0xff]  }
 0x186   :  { %v981_v9 = vpack.c.bf16 %v927_v47, %v925_v2  ;;  %v982_v12 = vpack.c.bf16 %v928_v57, %v926_v61  ;;  %v2279_v47 = vld [vmem:[%s3683_s4 + $0xc4] ss:$12 sps:$4 sm:$0xff]   ;;  %v2283_v2 = vld [vmem:[%s3683_s4 + $0xdc] ss:$12 sps:$4 sm:$0xff]  }
 0x187   :  { %v852_v14 = vpop.permute.xlu1 %851  ;;  %v2278_v57 = vld [vmem:[%s3683_s4 + $0xb0] ss:$12 sps:$4 sm:$0xff]   ;;  %v2282_v61 = vld [vmem:[%s3683_s4 + $0xc8] ss:$12 sps:$4 sm:$0xff]  }
 0x188   :  { %v945_v18 = vmul.f32 %v852_v14, %v651_v7  ;;  %v946_v19 = vmul.f32 %v852_v14, %v652_v8  ;;  %1486 = vmatprep.subr.bf16.mxu1 %v982_v12  ;;  %v2287_v7 = vld [vmem:[%s3683_s4 + $0xf4] ss:$12 sps:$4 sm:$0xff]   ;;  %v2291_v12 = vld [vmem:[%s3683_s4 + $0x10c] ss:$12 sps:$4 sm:$0xff]  }
 0x189   :  { %1487 = vmatpush1.bf16.msra.mxu1 %v981_v9  ;;  %v2286_v8 = vld [vmem:[%s3683_s4 + $0xe0] ss:$12 sps:$4 sm:$0xff]   ;;  %v2289_v9 = vld [vmem:[%s3683_s4 + $0xf0] ss:$12 sps:$4 sm:$0xff]   ;;  %v2293_v14 = vld [vmem:[%s3683_s4 + $0x108] ss:$12 sps:$4 sm:$0xff]  }
 0x18a   :  { %v991_v23 = vpack.c.bf16 %v947_v15, %v945_v18  ;;  %v992_v24 = vpack.c.bf16 %v948_v16, %v946_v19  ;;  %v2295_v15 = vld [vmem:[%s3683_s4 + $0x124] ss:$12 sps:$4 sm:$0xff]   ;;  %v2299_v18 = vld [vmem:[%s3683_s4 + $0x13c] ss:$12 sps:$4 sm:$0xff]  }
 0x18b   :  { %v812_v25 = vpop.permute.xlu1 %811  ;;  %v2294_v16 = vld [vmem:[%s3683_s4 + $0x110] ss:$12 sps:$4 sm:$0xff]   ;;  %v2298_v19 = vld [vmem:[%s3683_s4 + $0x128] ss:$12 sps:$4 sm:$0xff]  }
 0x18c   :  { %v929_v29 = vmul.f32 %v812_v25, %v635_v21  ;;  %v930_v30 = vmul.f32 %v812_v25, %v636_v22  ;;  %1707 = vmatprep.subr.bf16.mxu0 %v992_v24  ;;  %v2303_v21 = vld [vmem:[%s3683_s4 + $0x154] ss:$12 sps:$4 sm:$0xff]   ;;  %v2307_v24 = vld [vmem:[%s3683_s4 + $0x16c] ss:$12 sps:$4 sm:$0xff]  }
 0x18d   :  { %1708 = vmatpush1.bf16.msra.mxu0 %v991_v23  ;;  %v2302_v22 = vld [vmem:[%s3683_s4 + $0x140] ss:$12 sps:$4 sm:$0xff]   ;;  %v2305_v23 = vld [vmem:[%s3683_s4 + $0x150] ss:$12 sps:$4 sm:$0xff]   ;;  %v2306_v25 = vld [vmem:[%s3683_s4 + $0x158] ss:$12 sps:$4 sm:$0xff]  }
 0x18e   :  { %v983_v35 = vpack.c.bf16 %v931_v26, %v929_v29  ;;  %v984_v36 = vpack.c.bf16 %v932_v27, %v930_v30  ;;  %v2309_v26 = vld [vmem:[%s3683_s4 + $0x168] ss:$12 sps:$4 sm:$0xff]   ;;  %v2311_v27 = vld [vmem:[%s3683_s4 + $0x184] ss:$12 sps:$4 sm:$0xff]   ;;  %v2313_v29 = vld [vmem:[%s3683_s4 + $0x180] ss:$12 sps:$4 sm:$0xff]  }
 0x18f   :  { %v862_v37 = vpop.permute.xlu1 %861  ;;  %v2315_v30 = vld [vmem:[%s3683_s4 + $0x19c] ss:$12 sps:$4 sm:$0xff]  }
 0x190   :  { %v949_v40 = vmul.f32 %v862_v37, %v655_v33  ;;  %v950_v41 = vmul.f32 %v862_v37, %v656_v34  ;;  %1488 = vmatprep.subr.bf16.mxu1 %v984_v36  ;;  %v2314_v31 = vld [vmem:[%s3683_s4 + $0x188] ss:$12 sps:$4 sm:$0xff]   ;;  %v2318_v34 = vld [vmem:[%s3683_s4 + $0x1a0] ss:$12 sps:$4 sm:$0xff]   ;;  %v2322_v37 = vld [vmem:[%s3683_s4 + $0x1b8] ss:$12 sps:$4 sm:$0xff]  }
 0x191   :  { %1489 = vmatpush1.bf16.msra.mxu1 %v983_v35  ;;  %v2319_v33 = vld [vmem:[%s3683_s4 + $0x1b4] ss:$12 sps:$4 sm:$0xff]   ;;  %v2321_v35 = vld [vmem:[%s3683_s4 + $0x1b0] ss:$12 sps:$4 sm:$0xff]   ;;  %v2323_v36 = vld [vmem:[%s3683_s4 + $0x1cc] ss:$12 sps:$4 sm:$0xff]  }
 0x192   :  { %v993_v45 = vpack.c.bf16 %v951_v38, %v949_v40  ;;  %v994_v46 = vpack.c.bf16 %v952_v39, %v950_v41  ;;  %v2325_v38 = vld [vmem:[%s3683_s4 + $0x1c8] ss:$12 sps:$4 sm:$0xff]   ;;  %v2327_v39 = vld [vmem:[%s3683_s4 + $0x1e4] ss:$12 sps:$4 sm:$0xff]   ;;  %v2329_v41 = vld [vmem:[%s3683_s4 + $0x1e0] ss:$12 sps:$4 sm:$0xff]  }
 0x193   :  { %v2326_v40 = vld [vmem:[%s3683_s4 + $0x1d0] ss:$12 sps:$4 sm:$0xff]  }
 0x194   :  { %1709 = vmatprep.subr.bf16.mxu0 %v994_v46  ;;  %1491 = vmatmul.mubr.bf16.vlgmr.msra.gmra.mrb[0].mxu1 %v2247_v43  ;;  %v2330_v43 = vld [vmem:[%s3683_s4 + $0x1e8] ss:$12 sps:$4 sm:$0xff]  }
 0x195   :  { %1710 = vmatpush1.bf16.msra.mxu0 %v993_v45  ;;  %1500 = vmatprep.mubr.bf16.mxu1 %v2251_v44 }
 0x198   :  { %2139 = vmatmul.mubr.msk.bf16.vlgmr.msra.gmra.mrb[0].mxu0 %vm1394_vm1, %v2250_v49 }
 0x199   :  { %1743 = vmatprep.mubr.bf16.mxu0 %v2499_v48 }
 0x19c   :  { %1501 = vmatmul.mubr.bf16.gmra.mrb[4].mxu1 %v2253_v50 }
 0x19d   :  { %1510 = vmatprep.mubr.bf16.mxu1 %v2255_v51 }
 0x1a0   :  { %2140 = vmatmul.mubr.msk.bf16.gmra.mrb[4].mxu0 %vm1394_vm1, %v2254_v52 }
 0x1a1   :  { %1753 = vmatprep.mubr.bf16.mxu0 %v2499_v48 }
 0x1a4   :  { %1511 = vmatmul.mubr.bf16.gmra.mrb[8].mxu1 %v2257_v53 }
 0x1a5   :  { %1520 = vmatprep.mubr.bf16.mxu1 %v2259_v54 }
 0x1a8   :  { %2141 = vmatmul.mubr.msk.bf16.gmra.mrb[8].mxu0 %vm1394_vm1, %v2258_v55 }
 0x1a9   :  { %1763 = vmatprep.mubr.bf16.mxu0 %v2499_v48 }
 0x1ac   :  { %1521 = vmatmul.mubr.bf16.gmra.mrb[12].mxu1 %v2261_v56 }
 0x1ad   :  { %1530 = vmatprep.mubr.bf16.mxu1 %v2263_v58 }
 0x1b0   :  { %2142 = vmatmul.mubr.msk.bf16.gmra.mrb[12].mxu0 %vm1394_vm1, %v2262_v59 }
 0x1b1   :  { %1773 = vmatprep.mubr.bf16.mxu0 %v2499_v48 }
 0x1b4   :  { %1531 = vmatmul.mubr.bf16.gmra.mrb[16].mxu1 %v2265_v60 }
 0x1b5   :  { %1540 = vmatprep.mubr.bf16.mxu1 %v2267_v63 }
 0x1b8   :  { %2143 = vmatmul.mubr.msk.bf16.gmra.mrb[16].mxu0 %vm1394_vm1, %v2266_v3 }
 0x1b9   :  { %1783 = vmatprep.mubr.bf16.mxu0 %v2499_v48 }
 0x1bc   :  { %1541 = vmatmul.mubr.bf16.gmra.mrb[20].mxu1 %v2269_v4 }
 0x1bd   :  { %1550 = vmatprep.mubr.bf16.mxu1 %v2271_v5 }
 0x1c0   :  { %2144 = vmatmul.mubr.msk.bf16.gmra.mrb[20].mxu0 %vm1394_vm1, %v2270_v6 }
 0x1c1   :  { %1793 = vmatprep.mubr.bf16.mxu0 %v2499_v48 }
 0x1c4   :  { %1551 = vmatmul.mubr.bf16.gmra.mrb[24].mxu1 %v2273_v10 }
 0x1c5   :  { %1560 = vmatprep.mubr.bf16.mxu1 %v2275_v11 }
 0x1c8   :  { %2145 = vmatmul.mubr.msk.bf16.gmra.mrb[24].mxu0 %vm1394_vm1, %v2274_v1 }
 0x1c9   :  { %1803 = vmatprep.mubr.bf16.mxu0 %v2499_v48 }
 0x1cc   :  { %1561 = vmatmul.mubr.bf16.gmra.mrb[28].mxu1 %v2277_v42 }
 0x1cd   :  { %1570 = vmatprep.mubr.bf16.mxu1 %v2279_v47 }
 0x1d0   :  { %2146 = vmatmul.mubr.msk.bf16.gmra.mrb[28].mxu0 %vm1394_vm1, %v2278_v57 }
 0x1d1   :  { %1813 = vmatprep.mubr.bf16.mxu0 %v2499_v48 }
 0x1d4   :  { %1571 = vmatmul.mubr.bf16.gmra.mrb[32].mxu1 %v2281_v0 }
 0x1d5   :  { %1580 = vmatprep.mubr.bf16.mxu1 %v2283_v2 }
 0x1d8   :  { %2147 = vmatmul.mubr.msk.bf16.gmra.mrb[32].mxu0 %vm1394_vm1, %v2282_v61 }
 0x1d9   :  { %1823 = vmatprep.mubr.bf16.mxu0 %v2499_v48 }
 0x1dc   :  { %1581 = vmatmul.mubr.bf16.gmra.mrb[36].mxu1 %v2285_v62 }
 0x1dd   :  { %1590 = vmatprep.mubr.bf16.mxu1 %v2287_v7 }
 0x1e0   :  { %2148 = vmatmul.mubr.msk.bf16.gmra.mrb[36].mxu0 %vm1394_vm1, %v2286_v8 }
 0x1e1   :  { %1833 = vmatprep.mubr.bf16.mxu0 %v2499_v48 }
 0x1e4   :  { %1591 = vmatmul.mubr.bf16.gmra.mrb[40].mxu1 %v2289_v9 }
 0x1e5   :  { %1600 = vmatprep.mubr.bf16.mxu1 %v2291_v12 }
 0x1e8   :  { %2149 = vmatmul.mubr.msk.bf16.gmra.mrb[40].mxu0 %vm1394_vm1, %v2290_v13 }
 0x1e9   :  { %1843 = vmatprep.mubr.bf16.mxu0 %v2499_v48 }
 0x1ec   :  { %1601 = vmatmul.mubr.bf16.gmra.mrb[44].mxu1 %v2293_v14 }
 0x1ed   :  { %1610 = vmatprep.mubr.bf16.mxu1 %v2295_v15 }
 0x1f0   :  { %2150 = vmatmul.mubr.msk.bf16.gmra.mrb[44].mxu0 %vm1394_vm1, %v2294_v16 }
 0x1f1   :  { %1853 = vmatprep.mubr.bf16.mxu0 %v2499_v48 }
 0x1f4   :  { %1611 = vmatmul.mubr.bf16.gmra.mrb[48].mxu1 %v2297_v17 }
 0x1f5   :  { %1620 = vmatprep.mubr.bf16.mxu1 %v2299_v18 }
 0x1f8   :  { %2151 = vmatmul.mubr.msk.bf16.gmra.mrb[48].mxu0 %vm1394_vm1, %v2298_v19 }
 0x1f9   :  { %1863 = vmatprep.mubr.bf16.mxu0 %v2499_v48 }
 0x1fc   :  { %1621 = vmatmul.mubr.bf16.gmra.mrb[52].mxu1 %v2301_v20 }
 0x1fd   :  { %1630 = vmatprep.mubr.bf16.mxu1 %v2303_v21 }
 0x200   :  { %2152 = vmatmul.mubr.msk.bf16.gmra.mrb[52].mxu0 %vm1394_vm1, %v2302_v22 }
 0x201   :  { %1873 = vmatprep.mubr.bf16.mxu0 %v2499_v48 }
 0x204   :  { %1631 = vmatmul.mubr.bf16.gmra.mrb[56].mxu1 %v2305_v23 }
 0x205   :  { %1640 = vmatprep.mubr.bf16.mxu1 %v2307_v24 }
 0x208   :  { %2153 = vmatmul.mubr.msk.bf16.gmra.mrb[56].mxu0 %vm1394_vm1, %v2306_v25 }
 0x209   :  { %1883 = vmatprep.mubr.bf16.mxu0 %v2499_v48 }
 0x20c   :  { %1641 = vmatmul.mubr.bf16.gmra.mrb[60].mxu1 %v2309_v26 }
 0x20d   :  { %1650 = vmatprep.mubr.bf16.mxu1 %v2311_v27 }
 0x210   :  { %2154 = vmatmul.mubr.msk.bf16.gmra.mrb[60].mxu0 %vm1394_vm1, %v2310_v28 }
 0x211   :  { %1893 = vmatprep.mubr.bf16.mxu0 %v2499_v48 }
 0x214   :  { %1651 = vmatmul.mubr.bf16.gmra.mrb[64].mxu1 %v2313_v29 }
 0x215   :  { %1660 = vmatprep.mubr.bf16.mxu1 %v2315_v30 }
 0x218   :  { %2155 = vmatmul.mubr.msk.bf16.gmra.mrb[64].mxu0 %vm1394_vm1, %v2314_v31 }
 0x219   :  { %1903 = vmatprep.mubr.bf16.mxu0 %v2499_v48 }
 0x21c   :  { %1661 = vmatmul.mubr.bf16.gmra.mrb[68].mxu1 %v2317_v32 }
 0x21d   :  { %1670 = vmatprep.mubr.bf16.mxu1 %v2319_v33 }
 0x220   :  { %2156 = vmatmul.mubr.msk.bf16.gmra.mrb[68].mxu0 %vm1394_vm1, %v2318_v34 }
 0x221   :  { %1913 = vmatprep.mubr.bf16.mxu0 %v2499_v48 }
 0x224   :  { %1671 = vmatmul.mubr.bf16.gmra.mrb[72].mxu1 %v2321_v35 }
 0x225   :  { %1680 = vmatprep.mubr.bf16.mxu1 %v2323_v36 }
 0x228   :  { %2157 = vmatmul.mubr.msk.bf16.gmra.mrb[72].mxu0 %vm1394_vm1, %v2322_v37 }
 0x229   :  { %1923 = vmatprep.mubr.bf16.mxu0 %v2499_v48 }
 0x22c   :  { %1681 = vmatmul.mubr.bf16.gmra.mrb[76].mxu1 %v2325_v38 }
 0x22d   :  { %1690 = vmatprep.mubr.bf16.mxu1 %v2327_v39 }
 0x230   :  { %2158 = vmatmul.mubr.msk.bf16.gmra.mrb[76].mxu0 %vm1394_vm1, %v2326_v40 }
 0x231   :  { %1933 = vmatprep.mubr.bf16.mxu0 %v2499_v48 }
 0x234   :  { %1691 = vmatmul.mubr.bf16.gmra.mrb[80].mxu1 %v2329_v41 }
 0x238   :  { %2159 = vmatmul.mubr.msk.bf16.gmra.mrb[80].mxu0 %vm1394_vm1, %v2330_v43 }
 0x267   :  { %v1492_v44 = vpop.f32.mrb[0].mxu1 }
 0x268   :  { %v1494_v45 = vpop.f32.mrb[1].mxu1 }
 0x269   :  { %v1496_v46 = vpop.f32.mrb[2].mxu1 }
 0x26a   :  { %v1498_v49 = vpop.f32.mrb[3].mxu1 }
 0x26b   :  { %v1735_v50 = vpop.f32.mrb[0].mxu0 }
 0x26c   :  { %v1736_v51 = vadd.f32 %v1735_v50, %v1492_v44  ;;  %v1737_v52 = vpop.f32.mrb[1].mxu0 }
 0x26d   :  { %v1738_v53 = vadd.f32 %v1737_v52, %v1494_v45  ;;  %v1739_v54 = vpop.f32.mrb[2].mxu0 }
 0x26e   :  { %1944 = vst [vmem:[%s3685_s5] sm:$0xff] %v1736_v51  ;;  %v1740_v48 = vadd.f32 %v1739_v54, %v1496_v46  ;;  %v1741_v55 = vpop.f32.mrb[3].mxu0 }
 0x26f   :  { %1946 = vst.msk [vmem:[%s3685_s5 + $0x8] sm:$0xff] %vm1945_vm2, %v1738_v53  ;;  %v1742_v56 = vadd.f32 %v1741_v55, %v1498_v49  ;;  %v1502_v58 = vpop.f32.mrb[4].mxu1 }
 0x270   :  { %1947 = vst [vmem:[%s3685_s5 + $0x10] sm:$0xff] %v1740_v48  ;;  %v1504_v59 = vpop.f32.mrb[5].mxu1 }
 0x271   :  { %1948 = vst.msk [vmem:[%s3685_s5 + $0x18] sm:$0xff] %vm1945_vm2, %v1742_v56  ;;  %v1506_v60 = vpop.f32.mrb[6].mxu1 }
 0x272   :  { %v1508_v63 = vpop.f32.mrb[7].mxu1 }
 0x273   :  { %v1745_v3 = vpop.f32.mrb[4].mxu0 }
 0x274   :  { %v1746_v4 = vadd.f32 %v1745_v3, %v1502_v58  ;;  %v1747_v5 = vpop.f32.mrb[5].mxu0 }
 0x275   :  { %v1748_v6 = vadd.f32 %v1747_v5, %v1504_v59  ;;  %v1749_v10 = vpop.f32.mrb[6].mxu0 }
 0x276   :  { %1949 = vst [vmem:[%s3685_s5 + $0x20] sm:$0xff] %v1746_v4  ;;  %v1750_v11 = vadd.f32 %v1749_v10, %v1506_v60  ;;  %v1751_v1 = vpop.f32.mrb[7].mxu0 }
 0x277   :  { %1950 = vst.msk [vmem:[%s3685_s5 + $0x28] sm:$0xff] %vm1945_vm2, %v1748_v6  ;;  %v1752_v42 = vadd.f32 %v1751_v1, %v1508_v63  ;;  %v1512_v47 = vpop.f32.mrb[8].mxu1 }
 0x278   :  { %1951 = vst [vmem:[%s3685_s5 + $0x30] sm:$0xff] %v1750_v11  ;;  %v1514_v57 = vpop.f32.mrb[9].mxu1 }
 0x279   :  { %1952 = vst.msk [vmem:[%s3685_s5 + $0x38] sm:$0xff] %vm1945_vm2, %v1752_v42  ;;  %v1516_v0 = vpop.f32.mrb[10].mxu1 }
 0x27a   :  { %v1518_v2 = vpop.f32.mrb[11].mxu1 }
 0x27b   :  { %v1755_v61 = vpop.f32.mrb[8].mxu0 }
 0x27c   :  { %v1756_v62 = vadd.f32 %v1755_v61, %v1512_v47  ;;  %v1757_v7 = vpop.f32.mrb[9].mxu0 }
 0x27d   :  { %v1758_v8 = vadd.f32 %v1757_v7, %v1514_v57  ;;  %v1759_v9 = vpop.f32.mrb[10].mxu0 }
 0x27e   :  { %1953 = vst [vmem:[%s3685_s5 + $0x40] sm:$0xff] %v1756_v62  ;;  %v1760_v12 = vadd.f32 %v1759_v9, %v1516_v0  ;;  %v1761_v13 = vpop.f32.mrb[11].mxu0 }
 0x27f   :  { %1954 = vst.msk [vmem:[%s3685_s5 + $0x48] sm:$0xff] %vm1945_vm2, %v1758_v8  ;;  %v1762_v14 = vadd.f32 %v1761_v13, %v1518_v2  ;;  %v1522_v15 = vpop.f32.mrb[12].mxu1 }
 0x280   :  { %1955 = vst [vmem:[%s3685_s5 + $0x50] sm:$0xff] %v1760_v12  ;;  %v1524_v16 = vpop.f32.mrb[13].mxu1 }
 0x281   :  { %1956 = vst.msk [vmem:[%s3685_s5 + $0x58] sm:$0xff] %vm1945_vm2, %v1762_v14  ;;  %v1526_v17 = vpop.f32.mrb[14].mxu1 }
 0x282   :  { %v1528_v18 = vpop.f32.mrb[15].mxu1 }
 0x283   :  { %v1765_v19 = vpop.f32.mrb[12].mxu0 }
 0x284   :  { %v1766_v20 = vadd.f32 %v1765_v19, %v1522_v15  ;;  %v1767_v21 = vpop.f32.mrb[13].mxu0 }
 0x285   :  { %v1768_v22 = vadd.f32 %v1767_v21, %v1524_v16  ;;  %v1769_v23 = vpop.f32.mrb[14].mxu0 }
 0x286   :  { %1957 = vst [vmem:[%s3685_s5 + $0x60] sm:$0xff] %v1766_v20  ;;  %v1770_v24 = vadd.f32 %v1769_v23, %v1526_v17  ;;  %v1771_v25 = vpop.f32.mrb[15].mxu0 }
 0x287   :  { %1958 = vst.msk [vmem:[%s3685_s5 + $0x68] sm:$0xff] %vm1945_vm2, %v1768_v22  ;;  %v1772_v26 = vadd.f32 %v1771_v25, %v1528_v18  ;;  %v1532_v27 = vpop.f32.mrb[16].mxu1 }
 0x288   :  { %1959 = vst [vmem:[%s3685_s5 + $0x70] sm:$0xff] %v1770_v24  ;;  %v1534_v28 = vpop.f32.mrb[17].mxu1 }
 0x289   :  { %1960 = vst.msk [vmem:[%s3685_s5 + $0x78] sm:$0xff] %vm1945_vm2, %v1772_v26  ;;  %v1536_v29 = vpop.f32.mrb[18].mxu1 }
 0x28a   :  { %v1538_v30 = vpop.f32.mrb[19].mxu1 }
 0x28b   :  { %v1775_v31 = vpop.f32.mrb[16].mxu0 }
 0x28c   :  { %v1776_v32 = vadd.f32 %v1775_v31, %v1532_v27  ;;  %v1777_v33 = vpop.f32.mrb[17].mxu0 }
 0x28d   :  { %v1778_v34 = vadd.f32 %v1777_v33, %v1534_v28  ;;  %v1779_v35 = vpop.f32.mrb[18].mxu0 }
 0x28e   :  { %1961 = vst [vmem:[%s3685_s5 + $0x80] sm:$0xff] %v1776_v32  ;;  %v1780_v36 = vadd.f32 %v1779_v35, %v1536_v29  ;;  %v1781_v37 = vpop.f32.mrb[19].mxu0 }
 0x28f   :  { %1962 = vst.msk [vmem:[%s3685_s5 + $0x88] sm:$0xff] %vm1945_vm2, %v1778_v34  ;;  %v1782_v38 = vadd.f32 %v1781_v37, %v1538_v30  ;;  %v1542_v39 = vpop.f32.mrb[20].mxu1 }
 0x290   :  { %1963 = vst [vmem:[%s3685_s5 + $0x90] sm:$0xff] %v1780_v36  ;;  %v1544_v40 = vpop.f32.mrb[21].mxu1 }
 0x291   :  { %1964 = vst.msk [vmem:[%s3685_s5 + $0x98] sm:$0xff] %vm1945_vm2, %v1782_v38  ;;  %v1546_v41 = vpop.f32.mrb[22].mxu1 }
 0x292   :  { %v1548_v43 = vpop.f32.mrb[23].mxu1 }
 0x293   :  { %v1785_v44 = vpop.f32.mrb[20].mxu0 }
 0x294   :  { %v1786_v45 = vadd.f32 %v1785_v44, %v1542_v39  ;;  %v1787_v46 = vpop.f32.mrb[21].mxu0 }
 0x295   :  { %v1788_v49 = vadd.f32 %v1787_v46, %v1544_v40  ;;  %v1789_v50 = vpop.f32.mrb[22].mxu0 }
 0x296   :  { %1965 = vst [vmem:[%s3685_s5 + $0xa0] sm:$0xff] %v1786_v45  ;;  %v1790_v51 = vadd.f32 %v1789_v50, %v1546_v41  ;;  %v1791_v52 = vpop.f32.mrb[23].mxu0 }
 0x297   :  { %1966 = vst.msk [vmem:[%s3685_s5 + $0xa8] sm:$0xff] %vm1945_vm2, %v1788_v49  ;;  %v1792_v53 = vadd.f32 %v1791_v52, %v1548_v43  ;;  %v1552_v54 = vpop.f32.mrb[24].mxu1 }
 0x298   :  { %1967 = vst [vmem:[%s3685_s5 + $0xb0] sm:$0xff] %v1790_v51  ;;  %v1554_v48 = vpop.f32.mrb[25].mxu1 }
 0x299   :  { %1968 = vst.msk [vmem:[%s3685_s5 + $0xb8] sm:$0xff] %vm1945_vm2, %v1792_v53  ;;  %v1556_v55 = vpop.f32.mrb[26].mxu1 }
 0x29a   :  { %v1558_v56 = vpop.f32.mrb[27].mxu1 }
 0x29b   :  { %v1795_v58 = vpop.f32.mrb[24].mxu0 }
 0x29c   :  { %v1796_v59 = vadd.f32 %v1795_v58, %v1552_v54  ;;  %v1797_v60 = vpop.f32.mrb[25].mxu0 }
 0x29d   :  { %v1798_v63 = vadd.f32 %v1797_v60, %v1554_v48  ;;  %v1799_v3 = vpop.f32.mrb[26].mxu0 }
 0x29e   :  { %1969 = vst [vmem:[%s3685_s5 + $0xc0] sm:$0xff] %v1796_v59  ;;  %v1800_v4 = vadd.f32 %v1799_v3, %v1556_v55  ;;  %v1801_v5 = vpop.f32.mrb[27].mxu0 }
 0x29f   :  { %1970 = vst.msk [vmem:[%s3685_s5 + $0xc8] sm:$0xff] %vm1945_vm2, %v1798_v63  ;;  %v1802_v6 = vadd.f32 %v1801_v5, %v1558_v56  ;;  %v1562_v10 = vpop.f32.mrb[28].mxu1 }
 0x2a0   :  { %1971 = vst [vmem:[%s3685_s5 + $0xd0] sm:$0xff] %v1800_v4  ;;  %v1564_v11 = vpop.f32.mrb[29].mxu1 }
 0x2a1   :  { %1972 = vst.msk [vmem:[%s3685_s5 + $0xd8] sm:$0xff] %vm1945_vm2, %v1802_v6  ;;  %v1566_v1 = vpop.f32.mrb[30].mxu1 }
 0x2a2   :  { %v1568_v42 = vpop.f32.mrb[31].mxu1 }
 0x2a3   :  { %v1805_v47 = vpop.f32.mrb[28].mxu0 }
 0x2a4   :  { %v1806_v57 = vadd.f32 %v1805_v47, %v1562_v10  ;;  %v1807_v0 = vpop.f32.mrb[29].mxu0 }
 0x2a5   :  { %v1808_v2 = vadd.f32 %v1807_v0, %v1564_v11  ;;  %v1809_v61 = vpop.f32.mrb[30].mxu0 }
 0x2a6   :  { %1973 = vst [vmem:[%s3685_s5 + $0xe0] sm:$0xff] %v1806_v57  ;;  %v1810_v62 = vadd.f32 %v1809_v61, %v1566_v1  ;;  %v1811_v7 = vpop.f32.mrb[31].mxu0 }
 0x2a7   :  { %1974 = vst.msk [vmem:[%s3685_s5 + $0xe8] sm:$0xff] %vm1945_vm2, %v1808_v2  ;;  %v1812_v8 = vadd.f32 %v1811_v7, %v1568_v42  ;;  %v1572_v9 = vpop.f32.mrb[32].mxu1 }
 0x2a8   :  { %1975 = vst [vmem:[%s3685_s5 + $0xf0] sm:$0xff] %v1810_v62  ;;  %v1574_v12 = vpop.f32.mrb[33].mxu1 }
 0x2a9   :  { %1976 = vst.msk [vmem:[%s3685_s5 + $0xf8] sm:$0xff] %vm1945_vm2, %v1812_v8  ;;  %v1576_v13 = vpop.f32.mrb[34].mxu1 }
 0x2aa   :  { %v1578_v14 = vpop.f32.mrb[35].mxu1 }
 0x2ab   :  { %v1815_v15 = vpop.f32.mrb[32].mxu0 }
 0x2ac   :  { %v1816_v16 = vadd.f32 %v1815_v15, %v1572_v9  ;;  %v1817_v17 = vpop.f32.mrb[33].mxu0 }
 0x2ad   :  { %v1818_v18 = vadd.f32 %v1817_v17, %v1574_v12  ;;  %v1819_v19 = vpop.f32.mrb[34].mxu0 }
 0x2ae   :  { %1977 = vst [vmem:[%s3685_s5 + $0x100] sm:$0xff] %v1816_v16  ;;  %v1820_v20 = vadd.f32 %v1819_v19, %v1576_v13  ;;  %v1821_v21 = vpop.f32.mrb[35].mxu0 }
 0x2af   :  { %1978 = vst.msk [vmem:[%s3685_s5 + $0x108] sm:$0xff] %vm1945_vm2, %v1818_v18  ;;  %v1822_v22 = vadd.f32 %v1821_v21, %v1578_v14  ;;  %v1582_v23 = vpop.f32.mrb[36].mxu1 }
 0x2b0   :  { %1979 = vst [vmem:[%s3685_s5 + $0x110] sm:$0xff] %v1820_v20  ;;  %v1584_v24 = vpop.f32.mrb[37].mxu1 }
 0x2b1   :  { %1980 = vst.msk [vmem:[%s3685_s5 + $0x118] sm:$0xff] %vm1945_vm2, %v1822_v22  ;;  %v1586_v25 = vpop.f32.mrb[38].mxu1 }
 0x2b2   :  { %v1588_v26 = vpop.f32.mrb[39].mxu1 }
 0x2b3   :  { %v1825_v27 = vpop.f32.mrb[36].mxu0 }
 0x2b4   :  { %v1826_v28 = vadd.f32 %v1825_v27, %v1582_v23  ;;  %v1827_v29 = vpop.f32.mrb[37].mxu0 }
 0x2b5   :  { %v1828_v30 = vadd.f32 %v1827_v29, %v1584_v24  ;;  %v1829_v31 = vpop.f32.mrb[38].mxu0 }
 0x2b6   :  { %1981 = vst [vmem:[%s3685_s5 + $0x120] sm:$0xff] %v1826_v28  ;;  %v1830_v32 = vadd.f32 %v1829_v31, %v1586_v25  ;;  %v1831_v33 = vpop.f32.mrb[39].mxu0 }
 0x2b7   :  { %1982 = vst.msk [vmem:[%s3685_s5 + $0x128] sm:$0xff] %vm1945_vm2, %v1828_v30  ;;  %v1832_v34 = vadd.f32 %v1831_v33, %v1588_v26  ;;  %v1592_v35 = vpop.f32.mrb[40].mxu1 }
 0x2b8   :  { %1983 = vst [vmem:[%s3685_s5 + $0x130] sm:$0xff] %v1830_v32  ;;  %v1594_v36 = vpop.f32.mrb[41].mxu1 }
 0x2b9   :  { %1984 = vst.msk [vmem:[%s3685_s5 + $0x138] sm:$0xff] %vm1945_vm2, %v1832_v34  ;;  %v1596_v37 = vpop.f32.mrb[42].mxu1 }
 0x2ba   :  { %v1598_v38 = vpop.f32.mrb[43].mxu1 }
 0x2bb   :  { %v1835_v39 = vpop.f32.mrb[40].mxu0 }
 0x2bc   :  { %v1836_v40 = vadd.f32 %v1835_v39, %v1592_v35  ;;  %v1837_v41 = vpop.f32.mrb[41].mxu0 }
 0x2bd   :  { %v1838_v43 = vadd.f32 %v1837_v41, %v1594_v36  ;;  %v1839_v44 = vpop.f32.mrb[42].mxu0 }
 0x2be   :  { %1985 = vst [vmem:[%s3685_s5 + $0x140] sm:$0xff] %v1836_v40  ;;  %v1840_v45 = vadd.f32 %v1839_v44, %v1596_v37  ;;  %v1841_v46 = vpop.f32.mrb[43].mxu0 }
 0x2bf   :  { %1986 = vst.msk [vmem:[%s3685_s5 + $0x148] sm:$0xff] %vm1945_vm2, %v1838_v43  ;;  %v1842_v49 = vadd.f32 %v1841_v46, %v1598_v38  ;;  %v1602_v50 = vpop.f32.mrb[44].mxu1 }
 0x2c0   :  { %1987 = vst [vmem:[%s3685_s5 + $0x150] sm:$0xff] %v1840_v45  ;;  %v1604_v51 = vpop.f32.mrb[45].mxu1 }
 0x2c1   :  { %1988 = vst.msk [vmem:[%s3685_s5 + $0x158] sm:$0xff] %vm1945_vm2, %v1842_v49  ;;  %v1606_v52 = vpop.f32.mrb[46].mxu1 }
 0x2c2   :  { %v1608_v53 = vpop.f32.mrb[47].mxu1 }
 0x2c3   :  { %v1845_v54 = vpop.f32.mrb[44].mxu0 }
 0x2c4   :  { %v1846_v48 = vadd.f32 %v1845_v54, %v1602_v50  ;;  %v1847_v55 = vpop.f32.mrb[45].mxu0 }
 0x2c5   :  { %v1848_v56 = vadd.f32 %v1847_v55, %v1604_v51  ;;  %v1849_v58 = vpop.f32.mrb[46].mxu0 }
 0x2c6   :  { %1989 = vst [vmem:[%s3685_s5 + $0x160] sm:$0xff] %v1846_v48  ;;  %v1850_v59 = vadd.f32 %v1849_v58, %v1606_v52  ;;  %v1851_v60 = vpop.f32.mrb[47].mxu0 }
 0x2c7   :  { %1990 = vst.msk [vmem:[%s3685_s5 + $0x168] sm:$0xff] %vm1945_vm2, %v1848_v56  ;;  %v1852_v63 = vadd.f32 %v1851_v60, %v1608_v53  ;;  %v1612_v3 = vpop.f32.mrb[48].mxu1 }
 0x2c8   :  { %1991 = vst [vmem:[%s3685_s5 + $0x170] sm:$0xff] %v1850_v59  ;;  %v1614_v4 = vpop.f32.mrb[49].mxu1 }
 0x2c9   :  { %1992 = vst.msk [vmem:[%s3685_s5 + $0x178] sm:$0xff] %vm1945_vm2, %v1852_v63  ;;  %v1616_v5 = vpop.f32.mrb[50].mxu1 }
 0x2ca   :  { %v1618_v6 = vpop.f32.mrb[51].mxu1 }
 0x2cb   :  { %v1855_v10 = vpop.f32.mrb[48].mxu0 }
 0x2cc   :  { %v1856_v11 = vadd.f32 %v1855_v10, %v1612_v3  ;;  %v1857_v1 = vpop.f32.mrb[49].mxu0 }
 0x2cd   :  { %v1858_v42 = vadd.f32 %v1857_v1, %v1614_v4  ;;  %v1859_v47 = vpop.f32.mrb[50].mxu0 }
 0x2ce   :  { %1993 = vst [vmem:[%s3685_s5 + $0x180] sm:$0xff] %v1856_v11  ;;  %v1860_v57 = vadd.f32 %v1859_v47, %v1616_v5  ;;  %v1861_v0 = vpop.f32.mrb[51].mxu0 }
 0x2cf   :  { %1994 = vst.msk [vmem:[%s3685_s5 + $0x188] sm:$0xff] %vm1945_vm2, %v1858_v42  ;;  %v1862_v2 = vadd.f32 %v1861_v0, %v1618_v6  ;;  %v1622_v61 = vpop.f32.mrb[52].mxu1 }
 0x2d0   :  { %1995 = vst [vmem:[%s3685_s5 + $0x190] sm:$0xff] %v1860_v57  ;;  %v1624_v62 = vpop.f32.mrb[53].mxu1 }
 0x2d1   :  { %1996 = vst.msk [vmem:[%s3685_s5 + $0x198] sm:$0xff] %vm1945_vm2, %v1862_v2  ;;  %v1626_v7 = vpop.f32.mrb[54].mxu1 }
 0x2d2   :  { %v1628_v8 = vpop.f32.mrb[55].mxu1 }
 0x2d3   :  { %v1865_v9 = vpop.f32.mrb[52].mxu0 }
 0x2d4   :  { %v1866_v12 = vadd.f32 %v1865_v9, %v1622_v61  ;;  %v1867_v13 = vpop.f32.mrb[53].mxu0 }
 0x2d5   :  { %v1868_v14 = vadd.f32 %v1867_v13, %v1624_v62  ;;  %v1869_v15 = vpop.f32.mrb[54].mxu0 }
 0x2d6   :  { %1997 = vst [vmem:[%s3685_s5 + $0x1a0] sm:$0xff] %v1866_v12  ;;  %v1870_v16 = vadd.f32 %v1869_v15, %v1626_v7  ;;  %v1871_v17 = vpop.f32.mrb[55].mxu0 }
 0x2d7   :  { %1998 = vst.msk [vmem:[%s3685_s5 + $0x1a8] sm:$0xff] %vm1945_vm2, %v1868_v14  ;;  %v1872_v18 = vadd.f32 %v1871_v17, %v1628_v8  ;;  %v1632_v19 = vpop.f32.mrb[56].mxu1 }
 0x2d8   :  { %1999 = vst [vmem:[%s3685_s5 + $0x1b0] sm:$0xff] %v1870_v16  ;;  %v1634_v20 = vpop.f32.mrb[57].mxu1 }
 0x2d9   :  { %2000 = vst.msk [vmem:[%s3685_s5 + $0x1b8] sm:$0xff] %vm1945_vm2, %v1872_v18  ;;  %v1636_v21 = vpop.f32.mrb[58].mxu1 }
 0x2da   :  { %v1638_v22 = vpop.f32.mrb[59].mxu1 }
 0x2db   :  { %v1875_v23 = vpop.f32.mrb[56].mxu0 }
 0x2dc   :  { %v1876_v24 = vadd.f32 %v1875_v23, %v1632_v19  ;;  %v1877_v25 = vpop.f32.mrb[57].mxu0 }
 0x2dd   :  { %v1878_v26 = vadd.f32 %v1877_v25, %v1634_v20  ;;  %v1879_v27 = vpop.f32.mrb[58].mxu0 }
 0x2de   :  { %2001 = vst [vmem:[%s3685_s5 + $0x1c0] sm:$0xff] %v1876_v24  ;;  %v1880_v28 = vadd.f32 %v1879_v27, %v1636_v21  ;;  %v1881_v29 = vpop.f32.mrb[59].mxu0 }
 0x2df   :  { %2002 = vst.msk [vmem:[%s3685_s5 + $0x1c8] sm:$0xff] %vm1945_vm2, %v1878_v26  ;;  %v1882_v30 = vadd.f32 %v1881_v29, %v1638_v22  ;;  %v1642_v31 = vpop.f32.mrb[60].mxu1 }
 0x2e0   :  { %2003 = vst [vmem:[%s3685_s5 + $0x1d0] sm:$0xff] %v1880_v28  ;;  %v1644_v32 = vpop.f32.mrb[61].mxu1 }
 0x2e1   :  { %2004 = vst.msk [vmem:[%s3685_s5 + $0x1d8] sm:$0xff] %vm1945_vm2, %v1882_v30  ;;  %v1646_v33 = vpop.f32.mrb[62].mxu1 }
 0x2e2   :  { %v1648_v34 = vpop.f32.mrb[63].mxu1 }
 0x2e3   :  { %v1885_v35 = vpop.f32.mrb[60].mxu0 }
 0x2e4   :  { %v1886_v36 = vadd.f32 %v1885_v35, %v1642_v31  ;;  %v1887_v37 = vpop.f32.mrb[61].mxu0 }
 0x2e5   :  { %v1888_v38 = vadd.f32 %v1887_v37, %v1644_v32  ;;  %v1889_v39 = vpop.f32.mrb[62].mxu0 }
 0x2e6   :  { %2005 = vst [vmem:[%s3685_s5 + $0x1e0] sm:$0xff] %v1886_v36  ;;  %v1890_v40 = vadd.f32 %v1889_v39, %v1646_v33  ;;  %v1891_v41 = vpop.f32.mrb[63].mxu0 }
 0x2e7   :  { %2006 = vst.msk [vmem:[%s3685_s5 + $0x1e8] sm:$0xff] %vm1945_vm2, %v1888_v38  ;;  %v1892_v43 = vadd.f32 %v1891_v41, %v1648_v34  ;;  %v1652_v44 = vpop.f32.mrb[64].mxu1 }
 0x2e8   :  { %2007 = vst [vmem:[%s3685_s5 + $0x1f0] sm:$0xff] %v1890_v40  ;;  %v1654_v45 = vpop.f32.mrb[65].mxu1 }
 0x2e9   :  { %2008 = vst.msk [vmem:[%s3685_s5 + $0x1f8] sm:$0xff] %vm1945_vm2, %v1892_v43  ;;  %v1656_v46 = vpop.f32.mrb[66].mxu1 }
 0x2ea   :  { %v1658_v49 = vpop.f32.mrb[67].mxu1 }
 0x2eb   :  { %v1895_v50 = vpop.f32.mrb[64].mxu0 }
 0x2ec   :  { %v1896_v51 = vadd.f32 %v1895_v50, %v1652_v44  ;;  %v1897_v52 = vpop.f32.mrb[65].mxu0 }
 0x2ed   :  { %v1898_v53 = vadd.f32 %v1897_v52, %v1654_v45  ;;  %v1899_v54 = vpop.f32.mrb[66].mxu0 }
 0x2ee   :  { %2009 = vst [vmem:[%s3685_s5 + $0x200] sm:$0xff] %v1896_v51  ;;  %v1900_v48 = vadd.f32 %v1899_v54, %v1656_v46  ;;  %v1901_v55 = vpop.f32.mrb[67].mxu0 }
 0x2ef   :  { %2010 = vst.msk [vmem:[%s3685_s5 + $0x208] sm:$0xff] %vm1945_vm2, %v1898_v53  ;;  %v1902_v56 = vadd.f32 %v1901_v55, %v1658_v49  ;;  %v1662_v58 = vpop.f32.mrb[68].mxu1 }
 0x2f0   :  { %2011 = vst [vmem:[%s3685_s5 + $0x210] sm:$0xff] %v1900_v48  ;;  %v1664_v59 = vpop.f32.mrb[69].mxu1 }
 0x2f1   :  { %2012 = vst.msk [vmem:[%s3685_s5 + $0x218] sm:$0xff] %vm1945_vm2, %v1902_v56  ;;  %v1666_v60 = vpop.f32.mrb[70].mxu1 }
 0x2f2   :  { %v1668_v63 = vpop.f32.mrb[71].mxu1 }
 0x2f3   :  { %v1905_v3 = vpop.f32.mrb[68].mxu0 }
 0x2f4   :  { %v1906_v4 = vadd.f32 %v1905_v3, %v1662_v58  ;;  %v1907_v5 = vpop.f32.mrb[69].mxu0 }
 0x2f5   :  { %v1908_v6 = vadd.f32 %v1907_v5, %v1664_v59  ;;  %v1909_v10 = vpop.f32.mrb[70].mxu0 }
 0x2f6   :  { %2013 = vst [vmem:[%s3685_s5 + $0x220] sm:$0xff] %v1906_v4  ;;  %v1910_v11 = vadd.f32 %v1909_v10, %v1666_v60  ;;  %v1911_v1 = vpop.f32.mrb[71].mxu0 }
 0x2f7   :  { %2014 = vst.msk [vmem:[%s3685_s5 + $0x228] sm:$0xff] %vm1945_vm2, %v1908_v6  ;;  %v1912_v42 = vadd.f32 %v1911_v1, %v1668_v63  ;;  %v1672_v47 = vpop.f32.mrb[72].mxu1 }
 0x2f8   :  { %2015 = vst [vmem:[%s3685_s5 + $0x230] sm:$0xff] %v1910_v11  ;;  %v1674_v57 = vpop.f32.mrb[73].mxu1 }
 0x2f9   :  { %2016 = vst.msk [vmem:[%s3685_s5 + $0x238] sm:$0xff] %vm1945_vm2, %v1912_v42  ;;  %v1676_v0 = vpop.f32.mrb[74].mxu1 }
 0x2fa   :  { %v1678_v2 = vpop.f32.mrb[75].mxu1 }
 0x2fb   :  { %v1915_v61 = vpop.f32.mrb[72].mxu0 }
 0x2fc   :  { %v1916_v62 = vadd.f32 %v1915_v61, %v1672_v47  ;;  %v1917_v7 = vpop.f32.mrb[73].mxu0 }
 0x2fd   :  { %v1918_v8 = vadd.f32 %v1917_v7, %v1674_v57  ;;  %v1919_v9 = vpop.f32.mrb[74].mxu0 }
 0x2fe   :  { %2017 = vst [vmem:[%s3685_s5 + $0x240] sm:$0xff] %v1916_v62  ;;  %v1920_v12 = vadd.f32 %v1919_v9, %v1676_v0  ;;  %v1921_v13 = vpop.f32.mrb[75].mxu0 }
 0x2ff   :  { %2018 = vst.msk [vmem:[%s3685_s5 + $0x248] sm:$0xff] %vm1945_vm2, %v1918_v8  ;;  %v1922_v14 = vadd.f32 %v1921_v13, %v1678_v2  ;;  %v1682_v15 = vpop.f32.mrb[76].mxu1 }
 0x300   :  { %2019 = vst [vmem:[%s3685_s5 + $0x250] sm:$0xff] %v1920_v12  ;;  %v1684_v16 = vpop.f32.mrb[77].mxu1 }
 0x301   :  { %2020 = vst.msk [vmem:[%s3685_s5 + $0x258] sm:$0xff] %vm1945_vm2, %v1922_v14  ;;  %v1686_v17 = vpop.f32.mrb[78].mxu1 }
 0x302   :  { %v1688_v18 = vpop.f32.mrb[79].mxu1 }
 0x303   :  { %v1925_v19 = vpop.f32.mrb[76].mxu0 }
 0x304   :  { %v1926_v20 = vadd.f32 %v1925_v19, %v1682_v15  ;;  %v1927_v21 = vpop.f32.mrb[77].mxu0 }
 0x305   :  { %v1928_v22 = vadd.f32 %v1927_v21, %v1684_v16  ;;  %v1929_v23 = vpop.f32.mrb[78].mxu0 }
 0x306   :  { %2021 = vst [vmem:[%s3685_s5 + $0x260] sm:$0xff] %v1926_v20  ;;  %v1930_v24 = vadd.f32 %v1929_v23, %v1686_v17  ;;  %v1931_v25 = vpop.f32.mrb[79].mxu0 }
 0x307   :  { %2022 = vst.msk [vmem:[%s3685_s5 + $0x268] sm:$0xff] %vm1945_vm2, %v1928_v22  ;;  %v1932_v26 = vadd.f32 %v1931_v25, %v1688_v18  ;;  %v1692_v27 = vpop.f32.mrb[80].mxu1 }
 0x308   :  { %2023 = vst [vmem:[%s3685_s5 + $0x270] sm:$0xff] %v1930_v24  ;;  %v1694_v28 = vpop.f32.mrb[81].mxu1 }
 0x309   :  { %2024 = vst.msk [vmem:[%s3685_s5 + $0x278] sm:$0xff] %vm1945_vm2, %v1932_v26  ;;  %v1696_v29 = vpop.f32.mrb[82].mxu1 }
 0x30a   :  { %v1698_v30 = vpop.f32.mrb[83].mxu1 }
 0x30b   :  { %v1935_v31 = vpop.f32.mrb[80].mxu0 }
 0x30c   :  { %v1936_v32 = vadd.f32 %v1935_v31, %v1692_v27  ;;  %v1937_v33 = vpop.f32.mrb[81].mxu0 }
 0x30d   :  { %v1938_v34 = vadd.f32 %v1937_v33, %v1694_v28  ;;  %v1939_v35 = vpop.f32.mrb[82].mxu0 }
 0x30e   :  { %2025 = vst [vmem:[%s3685_s5 + $0x280] sm:$0xff] %v1936_v32  ;;  %v1940_v36 = vadd.f32 %v1939_v35, %v1696_v29  ;;  %v1941_v37 = vpop.f32.mrb[83].mxu0 }
 0x30f   :  { %2026 = vst.msk [vmem:[%s3685_s5 + $0x288] sm:$0xff] %vm1945_vm2, %v1938_v34  ;;  %v1942_v38 = vadd.f32 %v1941_v37, %v1698_v30 }
 0x310   :  { %2027 = vst [vmem:[%s3685_s5 + $0x290] sm:$0xff] %v1940_v36 }
 0x311   :  { %2028 = vst.msk [vmem:[%s3685_s5 + $0x298] sm:$0xff] %vm1945_vm2, %v1942_v38 }

</bundles_post_ra>
